<compile_context>
chip_gen: v6e
topology: v6e:2x2x1
jax: 0.10.0
libtpu: 0.0.40
codegen_flags: <defaults>
</compile_context>

<pallas_src>
import functools

import jax
import jax.numpy as jnp
from jax import lax
from jax.experimental import pallas as pl
from jax.experimental.pallas import tpu as pltpu


# ----------------------------- Pallas kernel -------------------------------- #

def _layernorm(x, gamma, beta, eps=1e-5):
    mu = jnp.mean(x, axis=-1, keepdims=True)
    var = jnp.mean((x - mu) ** 2, axis=-1, keepdims=True)
    return (x - mu) * lax.rsqrt(var + eps) * gamma + beta


def _pec_attn_kernel(B, N, num_heads, scale,
                     x_ref, c_ref, xpos_ref, cpos_ref,
                     xg_ref, xb_ref, cg_ref, cb_ref,
                     wq_ref, wk_ref, wv_ref, wp_ref, bp_ref,
                     o_ref):
    f32 = jnp.float32
    bf16 = jnp.bfloat16

    # pos-embed add + LayerNorms (f32).
    x = x_ref[...] + xpos_ref[...]                     # (B*N, E)
    c = c_ref[...] + cpos_ref[...]
    xn = _layernorm(x, xg_ref[...], xb_ref[...])       # x_norm1
    cn = _layernorm(c, cg_ref[...], cb_ref[...])       # c_norm1

    xn_b = xn.astype(bf16)
    cn_b = cn.astype(bf16)

    # Projections at full M = B*N rows; bf16 operands, f32 accumulation (MXU).
    # Attention scale folded into q once (dense (M, E) multiply, not per head).
    q  = (jnp.dot(xn_b, wq_ref[...], preferred_element_type=f32) * scale).astype(bf16)
    kx = jnp.dot(xn_b, wk_ref[...], preferred_element_type=f32).astype(bf16)
    kc = jnp.dot(cn_b, wk_ref[...], preferred_element_type=f32).astype(bf16)
    vx = jnp.dot(xn_b, wv_ref[...], preferred_element_type=f32).astype(bf16)
    vc = jnp.dot(cn_b, wv_ref[...], preferred_element_type=f32).astype(bf16)

    E = xn.shape[-1]
    hd = E // num_heads
    nt = (((1,), (1,)), ((), ()))                      # q @ k^T without explicit transpose

    batch_outs = []
    for b in range(B):                                 # static loops (B*num_heads small)
        rs = slice(b * N, (b + 1) * N)
        head_outs = []
        for h in range(num_heads):
            cs = slice(h * hd, (h + 1) * hd)
            qh, kxh, kch = q[rs, cs], kx[rs, cs], kc[rs, cs]
            vxh, vch = vx[rs, cs], vc[rs, cs]

            # scores vs keys [xn ; cn] as two NT matmuls (no (2N, E) concat copy).
            sx = lax.dot_general(qh, kxh, nt, preferred_element_type=f32)   # (N, N)
            sc = lax.dot_general(qh, kch, nt, preferred_element_type=f32)   # (N, N)

            # softmax over the virtual concatenation (f32).
            m = jnp.maximum(jnp.max(sx, axis=-1, keepdims=True),
                            jnp.max(sc, axis=-1, keepdims=True))
            px = jnp.exp(sx - m)
            pc = jnp.exp(sc - m)
            l = (jnp.sum(px, axis=-1, keepdims=True)
                 + jnp.sum(pc, axis=-1, keepdims=True))

            pv = (jnp.dot(px.astype(bf16), vxh, preferred_element_type=f32)
                  + jnp.dot(pc.astype(bf16), vch, preferred_element_type=f32))
            # Normalize on the dense (N, head_dim) output; divide goes to the EUP.
            head_outs.append(pv * pl.reciprocal(l, approx=True))
        batch_outs.append(jnp.concatenate(head_outs, axis=-1))              # (N, E)
    attn_out = jnp.concatenate(batch_outs, axis=0)                          # (B*N, E)

    # residual inside MultiHeadCrossAttention: (attn @ v) + x_copy  (x_copy = xn)
    attn_out = attn_out + xn
    # self.proj (Linear with bias), bf16 operands / f32 accumulate + bias in f32.
    proj = jnp.dot(attn_out.astype(bf16), wp_ref[...],
                   preferred_element_type=f32) + bp_ref[...]

    # outer residual: x = x_norm1(x) + drop1(attn(...))  (dropout = identity).
    # NOTE: matches the PyTorch code, which re-assigns x = x_norm1(x) before the add.
    o_ref[...] = xn + proj


# ------------------------------ JAX wrapper --------------------------------- #

def patch_embedding_cross_attention(reference_features, non_reference_features,
                                    params, patch_size, num_heads):
    B, C, H, W = reference_features.shape
    p = patch_size
    hn, wn = H // p, W // p
    N = hn * wn
    E = p * p * C
    hd = E // num_heads
    scale = hd ** -0.5
    M = B * N

    def to_tokens(a):
        # 'b c (h p1) (w p2) -> (b h w) (p1 p2 c)'  (batch fused into rows)
        a = a.reshape(B, C, hn, p, wn, p)
        a = a.transpose(0, 2, 4, 3, 5, 1)            # b h w p1 p2 c
        return a.reshape(M, E)

    x_tok = to_tokens(reference_features)
    c_tok = to_tokens(non_reference_features)

    # Pos embeddings tiled over batch (pure layout glue) so the kernel stays 2-D.
    xpos = jnp.tile(params["x_pos"], (B, 1))
    cpos = jnp.tile(params["c_pos"], (B, 1))

    # bf16 weights: MXU-native, half the DMA/VMEM bytes; accumulation stays f32.
    bf16 = jnp.bfloat16
    wq = params["wq"].astype(bf16)
    wk = params["wk"].astype(bf16)
    wv = params["wv"].astype(bf16)
    wp = params["wproj"].astype(bf16)

    kernel = functools.partial(_pec_attn_kernel, B, N, num_heads, scale)

    operands = (x_tok, c_tok, xpos, cpos,
                params["x_gamma"], params["x_beta"],
                params["c_gamma"], params["c_beta"],
                wq, wk, wv, wp, params["bproj"])

    flops = (6 * 2 * M * E * E                          # q, kx, kc, vx, vc, proj
             + B * num_heads * 2 * (2 * N * N * hd)     # score matmuls
             + B * num_heads * 2 * (2 * N * N * hd))    # prob @ v matmuls
    transcendentals = B * num_heads * N * (2 * N + 1)   # exp + reciprocal
    bytes_accessed = (sum(int(a.size) * a.dtype.itemsize for a in operands)
                      + M * E * 4)

    vmem_spec = pl.BlockSpec(memory_space=pltpu.MemorySpace.VMEM)
    out_tok = pl.pallas_call(
        kernel,
        out_shape=jax.ShapeDtypeStruct((M, E), jnp.float32),
        in_specs=[vmem_spec] * len(operands),
        out_specs=vmem_spec,
        cost_estimate=pl.CostEstimate(flops=flops,
                                      transcendentals=transcendentals,
                                      bytes_accessed=bytes_accessed),
    )(*operands)

    # '(b h w) (p1 p2 c) -> b c (h p1) (w p2)'
    t = out_tok.reshape(B, hn, wn, p, p, C).transpose(0, 5, 1, 3, 2, 4)
    return t.reshape(B, C, H, W)


# ---------------------------- pure-JAX reference ----------------------------- #

def reference_forward(reference_features, non_reference_features,
                      params, patch_size, num_heads):
    B, C, H, W = reference_features.shape
    p = patch_size
    hn, wn = H // p, W // p
    N, E = hn * wn, p * p * C
    hd = E // num_heads
    scale = hd ** -0.5

    def to_tokens(a):
        a = a.reshape(B, C, hn, p, wn, p).transpose(0, 2, 4, 3, 5, 1)
        return a.reshape(B, N, E)

    def ln(x, g, b):
        mu = x.mean(-1, keepdims=True)
        var = ((x - mu) ** 2).mean(-1, keepdims=True)
        return (x - mu) / jnp.sqrt(var + 1e-5) * g + b

    x = to_tokens(reference_features) + params["x_pos"]
    c = to_tokens(non_reference_features) + params["c_pos"]
    xn = ln(x, params["x_gamma"], params["x_beta"])
    cn = ln(c, params["c_gamma"], params["c_beta"])
    comp = jnp.concatenate([xn, cn], axis=1)                       # (B, 2N, E)

    q = (xn @ params["wq"]).reshape(B, N, num_heads, hd).transpose(0, 2, 1, 3)
    k = (comp @ params["wk"]).reshape(B, 2 * N, num_heads, hd).transpose(0, 2, 1, 3)
    v = (comp @ params["wv"]).reshape(B, 2 * N, num_heads, hd).transpose(0, 2, 1, 3)

    attn = jnp.einsum("bhnd,bhmd->bhnm", q, k) * scale
    attn = jax.nn.softmax(attn, axis=-1)
    o = jnp.einsum("bhnm,bhmd->bhnd", attn, v).transpose(0, 2, 1, 3).reshape(B, N, E)
    o = o + xn
    o = o @ params["wproj"] + params["bproj"]
    out_tok = xn + o

    t = out_tok.reshape(B, hn, wn, p, p, C).transpose(0, 5, 1, 3, 2, 4)
    return t.reshape(B, C, H, W)


# ---------------------------------- main ------------------------------------ #

if __name__ == "__main__":
    # Shapes consistent with the module: dim (channels)=16, spatial 16x16,
    # patch_size=4 -> num_patch N=16, emb_dim E=256; num_heads=2 -> head_dim=128.
    B, C, H, W = 2, 16, 16, 16
    patch_size = 4
    num_heads = 2
    N = (H // patch_size) * (W // patch_size)
    E = patch_size * patch_size * C

    key = jax.random.PRNGKey(0)
    keys = jax.random.split(key, 10)

    ref_feat = jax.random.normal(keys[0], (B, C, H, W), jnp.float32)
    nonref_feat = jax.random.normal(keys[1], (B, C, H, W), jnp.float32)

    params = {
        "x_pos":  jax.random.normal(keys[2], (N, E), jnp.float32),
        "c_pos":  jax.random.normal(keys[3], (N, E), jnp.float32),
        "x_gamma": jnp.ones((1, E), jnp.float32),
        "x_beta":  jnp.zeros((1, E), jnp.float32),
        "c_gamma": jnp.ones((1, E), jnp.float32),
        "c_beta":  jnp.zeros((1, E), jnp.float32),
        # Linear weights stored as (in, out) so the kernel computes x @ W directly;
        # to_kv's (2E, E) weight is stored as its split (wk, wv) halves.
        "wq":    0.02 * jax.random.normal(keys[4], (E, E), jnp.float32),
        "wk":    0.02 * jax.random.normal(keys[5], (E, E), jnp.float32),
        "wv":    0.02 * jax.random.normal(keys[6], (E, E), jnp.float32),
        "wproj": 0.02 * jax.random.normal(keys[7], (E, E), jnp.float32),
        "bproj": 0.02 * jax.random.normal(keys[8], (1, E), jnp.float32),
    }

    out = patch_embedding_cross_attention(ref_feat, nonref_feat, params,
                                          patch_size, num_heads)
    out = jax.block_until_ready(out)
    assert out.shape == (B, C, H, W), out.shape

    with jax.default_matmul_precision("highest"):
        ref_out = jax.block_until_ready(
            reference_forward(ref_feat, nonref_feat, params, patch_size, num_heads))

    err = float(jnp.max(jnp.abs(out - ref_out)))
    assert err < 5e-2, f"max abs error too large: {err}"
    print("KERNEL_OK")
</pallas_src>

<mosaic_0001>
module attributes {stable_mosaic.version = 11 : i64} {
  func.func @_pec_attn_kernel(%arg0: memref<32x256xf32, #tpu.memory_space<vmem>>, %arg1: memref<32x256xf32, #tpu.memory_space<vmem>>, %arg2: memref<32x256xf32, #tpu.memory_space<vmem>>, %arg3: memref<32x256xf32, #tpu.memory_space<vmem>>, %arg4: memref<1x256xf32, #tpu.memory_space<vmem>>, %arg5: memref<1x256xf32, #tpu.memory_space<vmem>>, %arg6: memref<1x256xf32, #tpu.memory_space<vmem>>, %arg7: memref<1x256xf32, #tpu.memory_space<vmem>>, %arg8: memref<256x256xbf16, #tpu.memory_space<vmem>>, %arg9: memref<256x256xbf16, #tpu.memory_space<vmem>>, %arg10: memref<256x256xbf16, #tpu.memory_space<vmem>>, %arg11: memref<256x256xbf16, #tpu.memory_space<vmem>>, %arg12: memref<1x256xf32, #tpu.memory_space<vmem>>, %arg13: memref<32x256xf32, #tpu.memory_space<vmem>>) attributes {dimension_semantics = [], scalar_prefetch = 0 : i64, scratch_operands = 0 : i64, tpu.core_type = #tpu.core_type<tc>} {
    %c0 = arith.constant 0 : index
    %c0_0 = arith.constant 0 : index
    %0 = vector.load %arg0[%c0, %c0_0] : memref<32x256xf32, #tpu.memory_space<vmem>>, vector<32x256xf32>
    %c0_1 = arith.constant 0 : index
    %c0_2 = arith.constant 0 : index
    %1 = vector.load %arg2[%c0_1, %c0_2] : memref<32x256xf32, #tpu.memory_space<vmem>>, vector<32x256xf32>
    %2 = arith.addf %0, %1 : vector<32x256xf32>
    %c0_3 = arith.constant 0 : index
    %c0_4 = arith.constant 0 : index
    %3 = vector.load %arg1[%c0_3, %c0_4] : memref<32x256xf32, #tpu.memory_space<vmem>>, vector<32x256xf32>
    %c0_5 = arith.constant 0 : index
    %c0_6 = arith.constant 0 : index
    %4 = vector.load %arg3[%c0_5, %c0_6] : memref<32x256xf32, #tpu.memory_space<vmem>>, vector<32x256xf32>
    %5 = arith.addf %3, %4 : vector<32x256xf32>
    %c0_7 = arith.constant 0 : index
    %c0_8 = arith.constant 0 : index
    %6 = vector.load %arg4[%c0_7, %c0_8] : memref<1x256xf32, #tpu.memory_space<vmem>>, vector<1x256xf32>
    %c0_9 = arith.constant 0 : index
    %c0_10 = arith.constant 0 : index
    %7 = vector.load %arg5[%c0_9, %c0_10] : memref<1x256xf32, #tpu.memory_space<vmem>>, vector<1x256xf32>
    %cst = arith.constant dense<0.000000e+00> : vector<32xf32>
    %8 = vector.multi_reduction <add>, %2, %cst [1] : vector<32x256xf32> to vector<32xf32>
    %9 = vector.shape_cast %8 : vector<32xf32> to vector<32x1xf32>
    %cst_11 = arith.constant 2.560000e+02 : f32
    %10 = vector.broadcast %cst_11 : f32 to vector<32x1xf32>
    %11 = arith.divf %9, %10 : vector<32x1xf32>
    %12 = vector.broadcast %11 : vector<32x1xf32> to vector<32x256xf32>
    %13 = arith.subf %2, %12 : vector<32x256xf32>
    %14 = arith.mulf %13, %13 : vector<32x256xf32>
    %cst_12 = arith.constant dense<0.000000e+00> : vector<32xf32>
    %15 = vector.multi_reduction <add>, %14, %cst_12 [1] : vector<32x256xf32> to vector<32xf32>
    %16 = vector.shape_cast %15 : vector<32xf32> to vector<32x1xf32>
    %cst_13 = arith.constant 2.560000e+02 : f32
    %17 = vector.broadcast %cst_13 : f32 to vector<32x1xf32>
    %18 = arith.divf %16, %17 : vector<32x1xf32>
    %19 = vector.broadcast %11 : vector<32x1xf32> to vector<32x256xf32>
    %20 = arith.subf %2, %19 : vector<32x256xf32>
    %cst_14 = arith.constant 9.99999974E-6 : f32
    %21 = vector.broadcast %cst_14 : f32 to vector<32x1xf32>
    %22 = arith.addf %18, %21 : vector<32x1xf32>
    %23 = math.rsqrt %22 : vector<32x1xf32>
    %24 = vector.broadcast %23 : vector<32x1xf32> to vector<32x256xf32>
    %25 = arith.mulf %20, %24 : vector<32x256xf32>
    %26 = vector.broadcast %6 : vector<1x256xf32> to vector<32x256xf32>
    %27 = arith.mulf %25, %26 : vector<32x256xf32>
    %28 = vector.broadcast %7 : vector<1x256xf32> to vector<32x256xf32>
    %29 = arith.addf %27, %28 : vector<32x256xf32>
    %c0_15 = arith.constant 0 : index
    %c0_16 = arith.constant 0 : index
    %30 = vector.load %arg6[%c0_15, %c0_16] : memref<1x256xf32, #tpu.memory_space<vmem>>, vector<1x256xf32>
    %c0_17 = arith.constant 0 : index
    %c0_18 = arith.constant 0 : index
    %31 = vector.load %arg7[%c0_17, %c0_18] : memref<1x256xf32, #tpu.memory_space<vmem>>, vector<1x256xf32>
    %cst_19 = arith.constant dense<0.000000e+00> : vector<32xf32>
    %32 = vector.multi_reduction <add>, %5, %cst_19 [1] : vector<32x256xf32> to vector<32xf32>
    %33 = vector.shape_cast %32 : vector<32xf32> to vector<32x1xf32>
    %cst_20 = arith.constant 2.560000e+02 : f32
    %34 = vector.broadcast %cst_20 : f32 to vector<32x1xf32>
    %35 = arith.divf %33, %34 : vector<32x1xf32>
    %36 = vector.broadcast %35 : vector<32x1xf32> to vector<32x256xf32>
    %37 = arith.subf %5, %36 : vector<32x256xf32>
    %38 = arith.mulf %37, %37 : vector<32x256xf32>
    %cst_21 = arith.constant dense<0.000000e+00> : vector<32xf32>
    %39 = vector.multi_reduction <add>, %38, %cst_21 [1] : vector<32x256xf32> to vector<32xf32>
    %40 = vector.shape_cast %39 : vector<32xf32> to vector<32x1xf32>
    %cst_22 = arith.constant 2.560000e+02 : f32
    %41 = vector.broadcast %cst_22 : f32 to vector<32x1xf32>
    %42 = arith.divf %40, %41 : vector<32x1xf32>
    %43 = vector.broadcast %35 : vector<32x1xf32> to vector<32x256xf32>
    %44 = arith.subf %5, %43 : vector<32x256xf32>
    %cst_23 = arith.constant 9.99999974E-6 : f32
    %45 = vector.broadcast %cst_23 : f32 to vector<32x1xf32>
    %46 = arith.addf %42, %45 : vector<32x1xf32>
    %47 = math.rsqrt %46 : vector<32x1xf32>
    %48 = vector.broadcast %47 : vector<32x1xf32> to vector<32x256xf32>
    %49 = arith.mulf %44, %48 : vector<32x256xf32>
    %50 = vector.broadcast %30 : vector<1x256xf32> to vector<32x256xf32>
    %51 = arith.mulf %49, %50 : vector<32x256xf32>
    %52 = vector.broadcast %31 : vector<1x256xf32> to vector<32x256xf32>
    %53 = arith.addf %51, %52 : vector<32x256xf32>
    %54 = arith.truncf %29 : vector<32x256xf32> to vector<32x256xbf16>
    %55 = arith.truncf %53 : vector<32x256xf32> to vector<32x256xbf16>
    %c0_24 = arith.constant 0 : index
    %c0_25 = arith.constant 0 : index
    %56 = vector.load %arg8[%c0_24, %c0_25] : memref<256x256xbf16, #tpu.memory_space<vmem>>, vector<256x256xbf16>
    %cst_26 = arith.constant dense<0.000000e+00> : vector<32x256xf32>
    %57 = tpu.matmul %54, %56, %cst_26 {dimension_numbers = #tpu.dot_dimension_numbers<[1], [0], [0], [1], [0, 0, 1, 1], [], []>} : vector<32x256xbf16>, vector<256x256xbf16>, vector<32x256xf32> -> vector<32x256xf32>
    %cst_27 = arith.constant 0.0883883461 : f32
    %58 = vector.broadcast %cst_27 : f32 to vector<32x256xf32>
    %59 = arith.mulf %57, %58 : vector<32x256xf32>
    %60 = arith.truncf %59 : vector<32x256xf32> to vector<32x256xbf16>
    %c0_28 = arith.constant 0 : index
    %c0_29 = arith.constant 0 : index
    %61 = vector.load %arg9[%c0_28, %c0_29] : memref<256x256xbf16, #tpu.memory_space<vmem>>, vector<256x256xbf16>
    %cst_30 = arith.constant dense<0.000000e+00> : vector<32x256xf32>
    %62 = tpu.matmul %54, %61, %cst_30 {dimension_numbers = #tpu.dot_dimension_numbers<[1], [0], [0], [1], [0, 0, 1, 1], [], []>} : vector<32x256xbf16>, vector<256x256xbf16>, vector<32x256xf32> -> vector<32x256xf32>
    %63 = arith.truncf %62 : vector<32x256xf32> to vector<32x256xbf16>
    %c0_31 = arith.constant 0 : index
    %c0_32 = arith.constant 0 : index
    %64 = vector.load %arg9[%c0_31, %c0_32] : memref<256x256xbf16, #tpu.memory_space<vmem>>, vector<256x256xbf16>
    %cst_33 = arith.constant dense<0.000000e+00> : vector<32x256xf32>
    %65 = tpu.matmul %55, %64, %cst_33 {dimension_numbers = #tpu.dot_dimension_numbers<[1], [0], [0], [1], [0, 0, 1, 1], [], []>} : vector<32x256xbf16>, vector<256x256xbf16>, vector<32x256xf32> -> vector<32x256xf32>
    %66 = arith.truncf %65 : vector<32x256xf32> to vector<32x256xbf16>
    %c0_34 = arith.constant 0 : index
    %c0_35 = arith.constant 0 : index
    %67 = vector.load %arg10[%c0_34, %c0_35] : memref<256x256xbf16, #tpu.memory_space<vmem>>, vector<256x256xbf16>
    %cst_36 = arith.constant dense<0.000000e+00> : vector<32x256xf32>
    %68 = tpu.matmul %54, %67, %cst_36 {dimension_numbers = #tpu.dot_dimension_numbers<[1], [0], [0], [1], [0, 0, 1, 1], [], []>} : vector<32x256xbf16>, vector<256x256xbf16>, vector<32x256xf32> -> vector<32x256xf32>
    %69 = arith.truncf %68 : vector<32x256xf32> to vector<32x256xbf16>
    %c0_37 = arith.constant 0 : index
    %c0_38 = arith.constant 0 : index
    %70 = vector.load %arg10[%c0_37, %c0_38] : memref<256x256xbf16, #tpu.memory_space<vmem>>, vector<256x256xbf16>
    %cst_39 = arith.constant dense<0.000000e+00> : vector<32x256xf32>
    %71 = tpu.matmul %55, %70, %cst_39 {dimension_numbers = #tpu.dot_dimension_numbers<[1], [0], [0], [1], [0, 0, 1, 1], [], []>} : vector<32x256xbf16>, vector<256x256xbf16>, vector<32x256xf32> -> vector<32x256xf32>
    %72 = arith.truncf %71 : vector<32x256xf32> to vector<32x256xbf16>
    %73 = vector.extract_strided_slice %60 {offsets = [0, 0], sizes = [16, 128], strides = [1, 1]} : vector<32x256xbf16> to vector<16x128xbf16>
    %74 = vector.extract_strided_slice %63 {offsets = [0, 0], sizes = [16, 128], strides = [1, 1]} : vector<32x256xbf16> to vector<16x128xbf16>
    %75 = vector.extract_strided_slice %66 {offsets = [0, 0], sizes = [16, 128], strides = [1, 1]} : vector<32x256xbf16> to vector<16x128xbf16>
    %76 = vector.extract_strided_slice %69 {offsets = [0, 0], sizes = [16, 128], strides = [1, 1]} : vector<32x256xbf16> to vector<16x128xbf16>
    %77 = vector.extract_strided_slice %72 {offsets = [0, 0], sizes = [16, 128], strides = [1, 1]} : vector<32x256xbf16> to vector<16x128xbf16>
    %cst_40 = arith.constant dense<0.000000e+00> : vector<16x16xf32>
    %78 = tpu.matmul %73, %74, %cst_40 {dimension_numbers = #tpu.dot_dimension_numbers<[1], [1], [0], [0], [0, 0, 1, 0], [], []>} : vector<16x128xbf16>, vector<16x128xbf16>, vector<16x16xf32> -> vector<16x16xf32>
    %cst_41 = arith.constant dense<0.000000e+00> : vector<16x16xf32>
    %79 = tpu.matmul %73, %75, %cst_41 {dimension_numbers = #tpu.dot_dimension_numbers<[1], [1], [0], [0], [0, 0, 1, 0], [], []>} : vector<16x128xbf16>, vector<16x128xbf16>, vector<16x16xf32> -> vector<16x16xf32>
    %cst_42 = arith.constant dense<0xFF800000> : vector<16xf32>
    %80 = vector.multi_reduction <maximumf>, %78, %cst_42 [1] : vector<16x16xf32> to vector<16xf32>
    %81 = vector.shape_cast %80 : vector<16xf32> to vector<16x1xf32>
    %cst_43 = arith.constant dense<0xFF800000> : vector<16xf32>
    %82 = vector.multi_reduction <maximumf>, %79, %cst_43 [1] : vector<16x16xf32> to vector<16xf32>
    %83 = vector.shape_cast %82 : vector<16xf32> to vector<16x1xf32>
    %84 = arith.maximumf %81, %83 : vector<16x1xf32>
    %85 = vector.broadcast %84 : vector<16x1xf32> to vector<16x16xf32>
    %86 = arith.subf %78, %85 : vector<16x16xf32>
    %87 = math.exp %86 : vector<16x16xf32>
    %88 = vector.broadcast %84 : vector<16x1xf32> to vector<16x16xf32>
    %89 = arith.subf %79, %88 : vector<16x16xf32>
    %90 = math.exp %89 : vector<16x16xf32>
    %cst_44 = arith.constant dense<0.000000e+00> : vector<16xf32>
    %91 = vector.multi_reduction <add>, %87, %cst_44 [1] : vector<16x16xf32> to vector<16xf32>
    %92 = vector.shape_cast %91 : vector<16xf32> to vector<16x1xf32>
    %cst_45 = arith.constant dense<0.000000e+00> : vector<16xf32>
    %93 = vector.multi_reduction <add>, %90, %cst_45 [1] : vector<16x16xf32> to vector<16xf32>
    %94 = vector.shape_cast %93 : vector<16xf32> to vector<16x1xf32>
    %95 = arith.addf %92, %94 : vector<16x1xf32>
    %96 = arith.truncf %87 : vector<16x16xf32> to vector<16x16xbf16>
    %cst_46 = arith.constant dense<0.000000e+00> : vector<16x128xf32>
    %97 = tpu.matmul %96, %76, %cst_46 {dimension_numbers = #tpu.dot_dimension_numbers<[1], [0], [0], [1], [0, 0, 1, 1], [], []>} : vector<16x16xbf16>, vector<16x128xbf16>, vector<16x128xf32> -> vector<16x128xf32>
    %98 = arith.truncf %90 : vector<16x16xf32> to vector<16x16xbf16>
    %cst_47 = arith.constant dense<0.000000e+00> : vector<16x128xf32>
    %99 = tpu.matmul %98, %77, %cst_47 {dimension_numbers = #tpu.dot_dimension_numbers<[1], [0], [0], [1], [0, 0, 1, 1], [], []>} : vector<16x16xbf16>, vector<16x128xbf16>, vector<16x128xf32> -> vector<16x128xf32>
    %100 = arith.addf %97, %99 : vector<16x128xf32>
    %101 = tpu.reciprocal %95 {approx = true} : vector<16x1xf32> -> vector<16x1xf32>
    %102 = vector.broadcast %101 : vector<16x1xf32> to vector<16x128xf32>
    %103 = arith.mulf %100, %102 : vector<16x128xf32>
    %104 = vector.extract_strided_slice %60 {offsets = [0, 128], sizes = [16, 128], strides = [1, 1]} : vector<32x256xbf16> to vector<16x128xbf16>
    %105 = vector.extract_strided_slice %63 {offsets = [0, 128], sizes = [16, 128], strides = [1, 1]} : vector<32x256xbf16> to vector<16x128xbf16>
    %106 = vector.extract_strided_slice %66 {offsets = [0, 128], sizes = [16, 128], strides = [1, 1]} : vector<32x256xbf16> to vector<16x128xbf16>
    %107 = vector.extract_strided_slice %69 {offsets = [0, 128], sizes = [16, 128], strides = [1, 1]} : vector<32x256xbf16> to vector<16x128xbf16>
    %108 = vector.extract_strided_slice %72 {offsets = [0, 128], sizes = [16, 128], strides = [1, 1]} : vector<32x256xbf16> to vector<16x128xbf16>
    %cst_48 = arith.constant dense<0.000000e+00> : vector<16x16xf32>
    %109 = tpu.matmul %104, %105, %cst_48 {dimension_numbers = #tpu.dot_dimension_numbers<[1], [1], [0], [0], [0, 0, 1, 0], [], []>} : vector<16x128xbf16>, vector<16x128xbf16>, vector<16x16xf32> -> vector<16x16xf32>
    %cst_49 = arith.constant dense<0.000000e+00> : vector<16x16xf32>
    %110 = tpu.matmul %104, %106, %cst_49 {dimension_numbers = #tpu.dot_dimension_numbers<[1], [1], [0], [0], [0, 0, 1, 0], [], []>} : vector<16x128xbf16>, vector<16x128xbf16>, vector<16x16xf32> -> vector<16x16xf32>
    %cst_50 = arith.constant dense<0xFF800000> : vector<16xf32>
    %111 = vector.multi_reduction <maximumf>, %109, %cst_50 [1] : vector<16x16xf32> to vector<16xf32>
    %112 = vector.shape_cast %111 : vector<16xf32> to vector<16x1xf32>
    %cst_51 = arith.constant dense<0xFF800000> : vector<16xf32>
    %113 = vector.multi_reduction <maximumf>, %110, %cst_51 [1] : vector<16x16xf32> to vector<16xf32>
    %114 = vector.shape_cast %113 : vector<16xf32> to vector<16x1xf32>
    %115 = arith.maximumf %112, %114 : vector<16x1xf32>
    %116 = vector.broadcast %115 : vector<16x1xf32> to vector<16x16xf32>
    %117 = arith.subf %109, %116 : vector<16x16xf32>
    %118 = math.exp %117 : vector<16x16xf32>
    %119 = vector.broadcast %115 : vector<16x1xf32> to vector<16x16xf32>
    %120 = arith.subf %110, %119 : vector<16x16xf32>
    %121 = math.exp %120 : vector<16x16xf32>
    %cst_52 = arith.constant dense<0.000000e+00> : vector<16xf32>
    %122 = vector.multi_reduction <add>, %118, %cst_52 [1] : vector<16x16xf32> to vector<16xf32>
    %123 = vector.shape_cast %122 : vector<16xf32> to vector<16x1xf32>
    %cst_53 = arith.constant dense<0.000000e+00> : vector<16xf32>
    %124 = vector.multi_reduction <add>, %121, %cst_53 [1] : vector<16x16xf32> to vector<16xf32>
    %125 = vector.shape_cast %124 : vector<16xf32> to vector<16x1xf32>
    %126 = arith.addf %123, %125 : vector<16x1xf32>
    %127 = arith.truncf %118 : vector<16x16xf32> to vector<16x16xbf16>
    %cst_54 = arith.constant dense<0.000000e+00> : vector<16x128xf32>
    %128 = tpu.matmul %127, %107, %cst_54 {dimension_numbers = #tpu.dot_dimension_numbers<[1], [0], [0], [1], [0, 0, 1, 1], [], []>} : vector<16x16xbf16>, vector<16x128xbf16>, vector<16x128xf32> -> vector<16x128xf32>
    %129 = arith.truncf %121 : vector<16x16xf32> to vector<16x16xbf16>
    %cst_55 = arith.constant dense<0.000000e+00> : vector<16x128xf32>
    %130 = tpu.matmul %129, %108, %cst_55 {dimension_numbers = #tpu.dot_dimension_numbers<[1], [0], [0], [1], [0, 0, 1, 1], [], []>} : vector<16x16xbf16>, vector<16x128xbf16>, vector<16x128xf32> -> vector<16x128xf32>
    %131 = arith.addf %128, %130 : vector<16x128xf32>
    %132 = tpu.reciprocal %126 {approx = true} : vector<16x1xf32> -> vector<16x1xf32>
    %133 = vector.broadcast %132 : vector<16x1xf32> to vector<16x128xf32>
    %134 = arith.mulf %131, %133 : vector<16x128xf32>
    %135 = tpu.concatenate %103, %134 in 1 : vector<16x128xf32>, vector<16x128xf32> -> vector<16x256xf32>
    %136 = vector.extract_strided_slice %60 {offsets = [16, 0], sizes = [16, 128], strides = [1, 1]} : vector<32x256xbf16> to vector<16x128xbf16>
    %137 = vector.extract_strided_slice %63 {offsets = [16, 0], sizes = [16, 128], strides = [1, 1]} : vector<32x256xbf16> to vector<16x128xbf16>
    %138 = vector.extract_strided_slice %66 {offsets = [16, 0], sizes = [16, 128], strides = [1, 1]} : vector<32x256xbf16> to vector<16x128xbf16>
    %139 = vector.extract_strided_slice %69 {offsets = [16, 0], sizes = [16, 128], strides = [1, 1]} : vector<32x256xbf16> to vector<16x128xbf16>
    %140 = vector.extract_strided_slice %72 {offsets = [16, 0], sizes = [16, 128], strides = [1, 1]} : vector<32x256xbf16> to vector<16x128xbf16>
    %cst_56 = arith.constant dense<0.000000e+00> : vector<16x16xf32>
    %141 = tpu.matmul %136, %137, %cst_56 {dimension_numbers = #tpu.dot_dimension_numbers<[1], [1], [0], [0], [0, 0, 1, 0], [], []>} : vector<16x128xbf16>, vector<16x128xbf16>, vector<16x16xf32> -> vector<16x16xf32>
    %cst_57 = arith.constant dense<0.000000e+00> : vector<16x16xf32>
    %142 = tpu.matmul %136, %138, %cst_57 {dimension_numbers = #tpu.dot_dimension_numbers<[1], [1], [0], [0], [0, 0, 1, 0], [], []>} : vector<16x128xbf16>, vector<16x128xbf16>, vector<16x16xf32> -> vector<16x16xf32>
    %cst_58 = arith.constant dense<0xFF800000> : vector<16xf32>
    %143 = vector.multi_reduction <maximumf>, %141, %cst_58 [1] : vector<16x16xf32> to vector<16xf32>
    %144 = vector.shape_cast %143 : vector<16xf32> to vector<16x1xf32>
    %cst_59 = arith.constant dense<0xFF800000> : vector<16xf32>
    %145 = vector.multi_reduction <maximumf>, %142, %cst_59 [1] : vector<16x16xf32> to vector<16xf32>
    %146 = vector.shape_cast %145 : vector<16xf32> to vector<16x1xf32>
    %147 = arith.maximumf %144, %146 : vector<16x1xf32>
    %148 = vector.broadcast %147 : vector<16x1xf32> to vector<16x16xf32>
    %149 = arith.subf %141, %148 : vector<16x16xf32>
    %150 = math.exp %149 : vector<16x16xf32>
    %151 = vector.broadcast %147 : vector<16x1xf32> to vector<16x16xf32>
    %152 = arith.subf %142, %151 : vector<16x16xf32>
    %153 = math.exp %152 : vector<16x16xf32>
    %cst_60 = arith.constant dense<0.000000e+00> : vector<16xf32>
    %154 = vector.multi_reduction <add>, %150, %cst_60 [1] : vector<16x16xf32> to vector<16xf32>
    %155 = vector.shape_cast %154 : vector<16xf32> to vector<16x1xf32>
    %cst_61 = arith.constant dense<0.000000e+00> : vector<16xf32>
    %156 = vector.multi_reduction <add>, %153, %cst_61 [1] : vector<16x16xf32> to vector<16xf32>
    %157 = vector.shape_cast %156 : vector<16xf32> to vector<16x1xf32>
    %158 = arith.addf %155, %157 : vector<16x1xf32>
    %159 = arith.truncf %150 : vector<16x16xf32> to vector<16x16xbf16>
    %cst_62 = arith.constant dense<0.000000e+00> : vector<16x128xf32>
    %160 = tpu.matmul %159, %139, %cst_62 {dimension_numbers = #tpu.dot_dimension_numbers<[1], [0], [0], [1], [0, 0, 1, 1], [], []>} : vector<16x16xbf16>, vector<16x128xbf16>, vector<16x128xf32> -> vector<16x128xf32>
    %161 = arith.truncf %153 : vector<16x16xf32> to vector<16x16xbf16>
    %cst_63 = arith.constant dense<0.000000e+00> : vector<16x128xf32>
    %162 = tpu.matmul %161, %140, %cst_63 {dimension_numbers = #tpu.dot_dimension_numbers<[1], [0], [0], [1], [0, 0, 1, 1], [], []>} : vector<16x16xbf16>, vector<16x128xbf16>, vector<16x128xf32> -> vector<16x128xf32>
    %163 = arith.addf %160, %162 : vector<16x128xf32>
    %164 = tpu.reciprocal %158 {approx = true} : vector<16x1xf32> -> vector<16x1xf32>
    %165 = vector.broadcast %164 : vector<16x1xf32> to vector<16x128xf32>
    %166 = arith.mulf %163, %165 : vector<16x128xf32>
    %167 = vector.extract_strided_slice %60 {offsets = [16, 128], sizes = [16, 128], strides = [1, 1]} : vector<32x256xbf16> to vector<16x128xbf16>
    %168 = vector.extract_strided_slice %63 {offsets = [16, 128], sizes = [16, 128], strides = [1, 1]} : vector<32x256xbf16> to vector<16x128xbf16>
    %169 = vector.extract_strided_slice %66 {offsets = [16, 128], sizes = [16, 128], strides = [1, 1]} : vector<32x256xbf16> to vector<16x128xbf16>
    %170 = vector.extract_strided_slice %69 {offsets = [16, 128], sizes = [16, 128], strides = [1, 1]} : vector<32x256xbf16> to vector<16x128xbf16>
    %171 = vector.extract_strided_slice %72 {offsets = [16, 128], sizes = [16, 128], strides = [1, 1]} : vector<32x256xbf16> to vector<16x128xbf16>
    %cst_64 = arith.constant dense<0.000000e+00> : vector<16x16xf32>
    %172 = tpu.matmul %167, %168, %cst_64 {dimension_numbers = #tpu.dot_dimension_numbers<[1], [1], [0], [0], [0, 0, 1, 0], [], []>} : vector<16x128xbf16>, vector<16x128xbf16>, vector<16x16xf32> -> vector<16x16xf32>
    %cst_65 = arith.constant dense<0.000000e+00> : vector<16x16xf32>
    %173 = tpu.matmul %167, %169, %cst_65 {dimension_numbers = #tpu.dot_dimension_numbers<[1], [1], [0], [0], [0, 0, 1, 0], [], []>} : vector<16x128xbf16>, vector<16x128xbf16>, vector<16x16xf32> -> vector<16x16xf32>
    %cst_66 = arith.constant dense<0xFF800000> : vector<16xf32>
    %174 = vector.multi_reduction <maximumf>, %172, %cst_66 [1] : vector<16x16xf32> to vector<16xf32>
    %175 = vector.shape_cast %174 : vector<16xf32> to vector<16x1xf32>
    %cst_67 = arith.constant dense<0xFF800000> : vector<16xf32>
    %176 = vector.multi_reduction <maximumf>, %173, %cst_67 [1] : vector<16x16xf32> to vector<16xf32>
    %177 = vector.shape_cast %176 : vector<16xf32> to vector<16x1xf32>
    %178 = arith.maximumf %175, %177 : vector<16x1xf32>
    %179 = vector.broadcast %178 : vector<16x1xf32> to vector<16x16xf32>
    %180 = arith.subf %172, %179 : vector<16x16xf32>
    %181 = math.exp %180 : vector<16x16xf32>
    %182 = vector.broadcast %178 : vector<16x1xf32> to vector<16x16xf32>
    %183 = arith.subf %173, %182 : vector<16x16xf32>
    %184 = math.exp %183 : vector<16x16xf32>
    %cst_68 = arith.constant dense<0.000000e+00> : vector<16xf32>
    %185 = vector.multi_reduction <add>, %181, %cst_68 [1] : vector<16x16xf32> to vector<16xf32>
    %186 = vector.shape_cast %185 : vector<16xf32> to vector<16x1xf32>
    %cst_69 = arith.constant dense<0.000000e+00> : vector<16xf32>
    %187 = vector.multi_reduction <add>, %184, %cst_69 [1] : vector<16x16xf32> to vector<16xf32>
    %188 = vector.shape_cast %187 : vector<16xf32> to vector<16x1xf32>
    %189 = arith.addf %186, %188 : vector<16x1xf32>
    %190 = arith.truncf %181 : vector<16x16xf32> to vector<16x16xbf16>
    %cst_70 = arith.constant dense<0.000000e+00> : vector<16x128xf32>
    %191 = tpu.matmul %190, %170, %cst_70 {dimension_numbers = #tpu.dot_dimension_numbers<[1], [0], [0], [1], [0, 0, 1, 1], [], []>} : vector<16x16xbf16>, vector<16x128xbf16>, vector<16x128xf32> -> vector<16x128xf32>
    %192 = arith.truncf %184 : vector<16x16xf32> to vector<16x16xbf16>
    %cst_71 = arith.constant dense<0.000000e+00> : vector<16x128xf32>
    %193 = tpu.matmul %192, %171, %cst_71 {dimension_numbers = #tpu.dot_dimension_numbers<[1], [0], [0], [1], [0, 0, 1, 1], [], []>} : vector<16x16xbf16>, vector<16x128xbf16>, vector<16x128xf32> -> vector<16x128xf32>
    %194 = arith.addf %191, %193 : vector<16x128xf32>
    %195 = tpu.reciprocal %189 {approx = true} : vector<16x1xf32> -> vector<16x1xf32>
    %196 = vector.broadcast %195 : vector<16x1xf32> to vector<16x128xf32>
    %197 = arith.mulf %194, %196 : vector<16x128xf32>
    %198 = tpu.concatenate %166, %197 in 1 : vector<16x128xf32>, vector<16x128xf32> -> vector<16x256xf32>
    %199 = tpu.concatenate %135, %198 in 0 : vector<16x256xf32>, vector<16x256xf32> -> vector<32x256xf32>
    %200 = arith.addf %199, %29 : vector<32x256xf32>
    %201 = arith.truncf %200 : vector<32x256xf32> to vector<32x256xbf16>
    %c0_72 = arith.constant 0 : index
    %c0_73 = arith.constant 0 : index
    %202 = vector.load %arg11[%c0_72, %c0_73] : memref<256x256xbf16, #tpu.memory_space<vmem>>, vector<256x256xbf16>
    %cst_74 = arith.constant dense<0.000000e+00> : vector<32x256xf32>
    %203 = tpu.matmul %201, %202, %cst_74 {dimension_numbers = #tpu.dot_dimension_numbers<[1], [0], [0], [1], [0, 0, 1, 1], [], []>} : vector<32x256xbf16>, vector<256x256xbf16>, vector<32x256xf32> -> vector<32x256xf32>
    %c0_75 = arith.constant 0 : index
    %c0_76 = arith.constant 0 : index
    %204 = vector.load %arg12[%c0_75, %c0_76] : memref<1x256xf32, #tpu.memory_space<vmem>>, vector<1x256xf32>
    %205 = vector.broadcast %204 : vector<1x256xf32> to vector<32x256xf32>
    %206 = arith.addf %203, %205 : vector<32x256xf32>
    %207 = arith.addf %29, %206 : vector<32x256xf32>
    %c0_77 = arith.constant 0 : index
    %c0_78 = arith.constant 0 : index
    %208 = vector.load %arg13[%c0_77, %c0_78] : memref<32x256xf32, #tpu.memory_space<vmem>>, vector<32x256xf32>
    tpu.vector_store %arg13[%c0_77, %c0_78], %207 {strides = array<i32>} : memref<32x256xf32, #tpu.memory_space<vmem>>, vector<32x256xf32>,
    return
  }
}

</mosaic_0001>

<bundles_post_ra>
// kernel: tpu_custom_call.1
= control target key start
LH: loop header
LB: loop body
LE: loop exit
PB: predicated region body
PF: predicated region fallthrough
CT: control target
= control target key end

     0   :  { %18 = vsyncpa [#allocation3], 0  ;;  %s4047_s0 = inlined_call_operand.hbm [shape: f32[32,256], index: 0, kind: input, shape index: {}]   ;;  %s4048_s1 = inlined_call_operand.hbm [shape: f32[32,256], index: 1, kind: input, shape index: {}]   ;;  %s4049_s2 = inlined_call_operand.hbm [shape: f32[32,256], index: 2, kind: input, shape index: {}]   ;;  %s4050_s3 = inlined_call_operand.hbm [shape: f32[32,256], index: 3, kind: input, shape index: {}]   ;;  %s4051_s4 = inlined_call_operand.vmem [shape: f32[1,256], index: 4, kind: input, shape index: {}]   ;;  %s4052_s5 = inlined_call_operand.vmem [shape: f32[1,256], index: 5, kind: input, shape index: {}]   ;;  %s4053_s6 = inlined_call_operand.vmem [shape: f32[1,256], index: 6, kind: input, shape index: {}]   ;;  %s4054_s7 = inlined_call_operand.vmem [shape: f32[1,256], index: 7, kind: input, shape index: {}]   ;;  %s4055_s8 = inlined_call_operand.hbm [shape: bf16[256,256], index: 8, kind: input, shape index: {}]   ;;  %s4056_s9 = inlined_call_operand.hbm [shape: bf16[256,256], index: 9, kind: input, shape index: {}]   ;;  %s4057_s10 = inlined_call_operand.hbm [shape: bf16[256,256], index: 10, kind: input, shape index: {}]   ;;  %s4058_s11 = inlined_call_operand.hbm [shape: bf16[256,256], index: 11, kind: input, shape index: {}]   ;;  %s4059_s12 = inlined_call_operand.vmem [shape: f32[1,256], index: 12, kind: input, shape index: {}]   ;;  %s4060_s13 = inlined_call_operand.hbm [shape: f32[32,256], index: 13, kind: output, shape index: {}]  }
   0x1   :  { %19 = vsyncpa [#allocation6], 0 }
   0x2   :  { %20 = vsyncpa [#allocation9], 0 }
   0x3   :  { %21 = vsyncpa [#allocation12], 0 }
   0x4   :  { %22 = vsyncpa [#allocation15], 0 }
   0x5   :  { %23 = vsyncpa [#allocation4], 0  ;;  %s3187_s25 = smov [#allocation5]   ;;  %s3188_s27 = smov [#allocation8]  }
   0x6   :  { %s41_s26 = sshll.u32 %s3187_s25, 4  ;;  %s65_s28 = sshll.u32 %s3188_s27, 4  ;;  %s42_s26 = int_to_ptr.vmem [resolvable:$true] %s41_s26  ;;  %s66_s28 = int_to_ptr.vmem [resolvable:$true] %s65_s28 }
   0x7   :  { %s3003_s29 = scalar_lea.vmem %s42_s26, 1024  ;;  %p3008_p1 = scmp.lt.s32.totalorder %s42_s26, %s42_s26 }
   0x8   :  { %p3004_p0 = scmp.ne.s32.totalorder %s42_s26, %s3003_s29  ;;  %p3009_p2 = scmp.lt.s32.totalorder %s3003_s29, %s3003_s29 }
   0xa   :  { %p3010_p3 = por %p3009_p2, %p3008_p1 }
   0xc   :  { %p3011_p4 = pnand %p3010_p3, %p3004_p0 }
   0xe   :  { %3014 = shalt.err (!%p3011_p4)
}
   0xf   :  { %s3189_s30 = smov 256   ;;  %s3190_s14 = smov 16  }
  0x10   :  { %47 = dma.hbm_to_vmem [thread:$0]  %s4048_s1, 1024, %s42_s26, [#allocation6], %s3189_s30, %s3189_s30, %s3190_s14  }
  0x11   :  { %s3023_s17 = scalar_lea.vmem %s66_s28, 1024  ;;  %p3028_p6 = scmp.lt.s32.totalorder %s66_s28, %s66_s28 }
  0x12   :  { %p3024_p5 = scmp.ne.s32.totalorder %s66_s28, %s3023_s17  ;;  %p3029_p7 = scmp.lt.s32.totalorder %s3023_s17, %s3023_s17 }
  0x14   :  { %p3030_p8 = por %p3029_p7, %p3028_p6 }
  0x16   :  { %p3031_p9 = pnand %p3030_p8, %p3024_p5 }
  0x18   :  { %3034 = shalt.err (!%p3031_p9)
}
  0x19   :  { %71 = dma.hbm_to_vmem [thread:$0]  %s4050_s3, 1024, %s66_s28, [#allocation9], %s3189_s30, %s3189_s30, %s3190_s14  }
  0x1a   :  { %s3191_s20 = smov [#allocation11]   ;;  %s3192_s22 = smov [#allocation2]  }
  0x1b   :  { %s97_s21 = sshll.u32 %s3191_s20, 4  ;;  %s29_s23 = sshll.u32 %s3192_s22, 4  ;;  %s98_s21 = int_to_ptr.vmem [resolvable:$true] %s97_s21  ;;  %s30_s23 = int_to_ptr.vmem [resolvable:$true] %s29_s23 }
  0x1c   :  { %s3043_s1 = scalar_lea.vmem %s98_s21, 4096  ;;  %p3048_p11 = scmp.lt.s32.totalorder %s98_s21, %s98_s21 }
  0x1d   :  { %p3044_p10 = scmp.ne.s32.totalorder %s98_s21, %s3043_s1  ;;  %p3049_p12 = scmp.lt.s32.totalorder %s3043_s1, %s3043_s1 }
  0x1f   :  { %p3050_p13 = por %p3049_p12, %p3048_p11 }
  0x21   :  { %p3051_p0 = pnand %p3050_p13, %p3044_p10 }
  0x23   :  { %3054 = shalt.err (!%p3051_p0)
}
  0x24   :  { %s3193_s24 = smov 128   ;;  %s3194_s25 = smov 8  }
  0x25   :  { %103 = dma.hbm_to_vmem [thread:$0]  %s4056_s9, 4096, %s98_s21, [#allocation12], %s3193_s24, %s3193_s24, %s3194_s25  }
  0x26   :  { %s3063_s27 = scalar_lea.vmem %s30_s23, 1024  ;;  %p3068_p2 = scmp.lt.s32.totalorder %s30_s23, %s30_s23 }
  0x27   :  { %p3064_p1 = scmp.ne.s32.totalorder %s30_s23, %s3063_s27  ;;  %p3069_p3 = scmp.lt.s32.totalorder %s3063_s27, %s3063_s27 }
  0x29   :  { %p3070_p4 = por %p3069_p3, %p3068_p2 }
  0x2b   :  { %p3071_p5 = pnand %p3070_p4, %p3064_p1 }
  0x2d   :  { %3074 = shalt.err (!%p3071_p5)
}
  0x2e   :  { %35 = dma.hbm_to_vmem [thread:$0]  %s4047_s0, 1024, %s30_s23, [#allocation3], %s3189_s30, %s3189_s30, %s3190_s14  }
  0x2f   :  { %s3195_s15 = smov [#allocation7]   ;;  %s3196_s17 = smov [#allocation10]  }
  0x30   :  { %s53_s16 = sshll.u32 %s3195_s15, 4  ;;  %s85_s18 = sshll.u32 %s3196_s17, 4  ;;  %s54_s16 = int_to_ptr.vmem [resolvable:$true] %s53_s16  ;;  %s86_s18 = int_to_ptr.vmem [resolvable:$true] %s85_s18 }
  0x31   :  { %s3083_s9 = scalar_lea.vmem %s54_s16, 1024  ;;  %p3088_p7 = scmp.lt.s32.totalorder %s54_s16, %s54_s16 }
  0x32   :  { %p3084_p6 = scmp.ne.s32.totalorder %s54_s16, %s3083_s9  ;;  %p3089_p8 = scmp.lt.s32.totalorder %s3083_s9, %s3083_s9 }
  0x34   :  { %p3090_p9 = por %p3089_p8, %p3088_p7 }
  0x36   :  { %p3091_p10 = pnand %p3090_p9, %p3084_p6 }
  0x38   :  { %3094 = shalt.err (!%p3091_p10)
}
  0x39   :  { %59 = dma.hbm_to_vmem [thread:$0]  %s4049_s2, 1024, %s54_s16, [#allocation6], %s3189_s30, %s3189_s30, %s3190_s14  }
  0x3a   :  { %s3103_s0 = scalar_lea.vmem %s86_s18, 4096  ;;  %p3108_p12 = scmp.lt.s32.totalorder %s86_s18, %s86_s18 }
  0x3b   :  { %p3104_p11 = scmp.ne.s32.totalorder %s86_s18, %s3103_s0  ;;  %p3109_p13 = scmp.lt.s32.totalorder %s3103_s0, %s3103_s0 }
  0x3d   :  { %p3110_p0 = por %p3109_p13, %p3108_p12 }
  0x3f   :  { %p3111_p1 = pnand %p3110_p0, %p3104_p11 }
  0x41   :  { %3114 = shalt.err (!%p3111_p1)
}
  0x42   :  { %91 = dma.hbm_to_vmem [thread:$0]  %s4055_s8, 4096, %s86_s18, [#allocation9], %s3193_s24, %s3193_s24, %s3194_s25  }
  0x43   :  { %s3197_s23 = smov [#allocation13]   ;;  %s3198_s26 = smov [#allocation14]  }
  0x44   :  { %s109_s1 = sshll.u32 %s3197_s23, 4  ;;  %s121_s3 = sshll.u32 %s3198_s26, 4  ;;  %s110_s1 = int_to_ptr.vmem [resolvable:$true] %s109_s1  ;;  %s122_s3 = int_to_ptr.vmem [resolvable:$true] %s121_s3 }
  0x45   :  { %s3123_s2 = scalar_lea.vmem %s110_s1, 4096  ;;  %p3128_p3 = scmp.lt.s32.totalorder %s110_s1, %s110_s1 }
  0x46   :  { %p3124_p2 = scmp.ne.s32.totalorder %s110_s1, %s3123_s2  ;;  %p3129_p4 = scmp.lt.s32.totalorder %s3123_s2, %s3123_s2 }
  0x48   :  { %p3130_p5 = por %p3129_p4, %p3128_p3 }
  0x4a   :  { %p3131_p6 = pnand %p3130_p5, %p3124_p2 }
  0x4c   :  { %3134 = shalt.err (!%p3131_p6)
}
  0x4d   :  { %115 = dma.hbm_to_vmem [thread:$0]  %s4057_s10, 4096, %s110_s1, [#allocation12], %s3193_s24, %s3193_s24, %s3194_s25  }
  0x4e   :  { %s3143_s8 = scalar_lea.vmem %s122_s3, 4096  ;;  %p3148_p8 = scmp.lt.s32.totalorder %s122_s3, %s122_s3 }
  0x4f   :  { %p3144_p7 = scmp.ne.s32.totalorder %s122_s3, %s3143_s8  ;;  %p3149_p9 = scmp.lt.s32.totalorder %s3143_s8, %s3143_s8 }
  0x51   :  { %p3150_p10 = por %p3149_p9, %p3148_p8 }
  0x53   :  { %p3151_p11 = pnand %p3150_p10, %p3144_p7 }
  0x55   :  { %3154 = shalt.err (!%p3151_p11)
}
  0x56   :  { %127 = dma.hbm_to_vmem [thread:$0]  %s4058_s11, 4096, %s122_s3, [#allocation15], %s3193_s24, %s3193_s24, %s3194_s25  }
  0x57   :  { %3175 = dma.done.wait [#allocation3], 1024  }
  0x58   :  { %3176 = vsyncadd [#allocation3], 4294966272 }
  0x59   :  { %3177 = dma.done.wait [#allocation6], 2048  }
  0x5a   :  { %3178 = vsyncadd [#allocation6], 4294965248 }
  0x5b   :  { %3179 = dma.done.wait [#allocation9], 5120  }
  0x5c   :  { %3180 = vsyncadd [#allocation9], 4294962176 }
  0x5d   :  { %3181 = dma.done.wait [#allocation12], 8192  }
  0x5e   :  { %3182 = vsyncadd [#allocation12], 4294959104 }
  0x5f   :  { %3183 = dma.done.wait [#allocation15], 4096  }
  0x60   :  { %3184 = vsyncadd [#allocation15], 4294963200  ;;  %v155_v0 = vld [vmem:[#allocation2] sm:$0xff]  ;;  %v156_v1 = vld [vmem:[#allocation2 + $0x8] sm:$0xff]  ;;  %vm3200_vm0 = vmmov 0   ;;  %vm1371_vm1 = vcmask 130048  }
  0x61   :  { %v163_v2 = vld [vmem:[#allocation7] sm:$0xff]  ;;  %v164_v3 = vld [vmem:[#allocation7 + $0x8] sm:$0xff]  ;;  %v157_v10 = vld [vmem:[#allocation2 + $0x10] sm:$0xff] }
  0x62   :  { %v3320_v4 = vadd.f32 %v163_v2, %v155_v0  ;;  %v159_v5 = vld [vmem:[#allocation2 + $0x20] sm:$0xff]  ;;  %v160_v6 = vld [vmem:[#allocation2 + $0x28] sm:$0xff]  ;;  %v3322_v7 = vadd.f32 %v164_v3, %v156_v1  ;;  %v158_v13 = vld [vmem:[#allocation2 + $0x18] sm:$0xff] }
  0x63   :  { %v167_v8 = vld [vmem:[#allocation7 + $0x20] sm:$0xff]  ;;  %v168_v9 = vld [vmem:[#allocation7 + $0x28] sm:$0xff]  ;;  %v165_v14 = vld [vmem:[#allocation7 + $0x10] sm:$0xff] }
  0x64   :  { %v3324_v11 = vadd.f32 %v167_v8, %v159_v5  ;;  %v3326_v12 = vadd.f32 %v168_v9, %v160_v6  ;;  %v166_v15 = vld [vmem:[#allocation7 + $0x18] sm:$0xff]  ;;  %v205_v16 = vadd.f32 %v3322_v7, %v3320_v4  ;;  %v3330_v17 = vadd.f32 %v165_v14, %v157_v10  ;;  %v161_v19 = vld [vmem:[#allocation2 + $0x30] sm:$0xff]  ;;  %v179_v25 = vld [vmem:[#allocation5] sm:$0xff] }
  0x65   :  { %v3332_v18 = vadd.f32 %v166_v15, %v158_v13  ;;  %v162_v20 = vld [vmem:[#allocation2 + $0x38] sm:$0xff]  ;;  %v169_v21 = vld [vmem:[#allocation7 + $0x30] sm:$0xff]  ;;  %v180_v26 = vld [vmem:[#allocation5 + $0x8] sm:$0xff] }
  0x66   :  { %v211_v22 = vadd.f32 %v3326_v12, %v3324_v11  ;;  %v170_v23 = vld [vmem:[#allocation7 + $0x38] sm:$0xff]  ;;  %v3336_v24 = vadd.f32 %v169_v21, %v161_v19  ;;  %206 = vadd.xlane.f32.xlu0 %v205_v16  ;;  %v187_v29 = vld [vmem:[#allocation8] sm:$0xff]  ;;  %v188_v30 = vld [vmem:[#allocation8 + $0x8] sm:$0xff] }
  0x67   :  { %v208_v27 = vadd.f32 %v3332_v18, %v3330_v17  ;;  %v3340_v28 = vadd.f32 %v170_v23, %v162_v20  ;;  %v181_v31 = vld [vmem:[#allocation5 + $0x10] sm:$0xff]  ;;  %v3342_v32 = vadd.f32 %v187_v29, %v179_v25  ;;  %v3344_v33 = vadd.f32 %v188_v30, %v180_v26  ;;  %v182_v34 = vld [vmem:[#allocation5 + $0x18] sm:$0xff]  ;;  %v2742_v44 = vld [vmem:[#allocation10 + $0x64] ss:$8 sps:$4 sm:$0xff]  }
  0x68   :  { %212 = vadd.xlane.f32.xlu1 %v211_v22  ;;  %v189_v35 = vld [vmem:[#allocation8 + $0x10] sm:$0xff]  ;;  %v190_v36 = vld [vmem:[#allocation8 + $0x18] sm:$0xff]  ;;  %v2744_v47 = vld [vmem:[#allocation10 + $0x60] ss:$8 sps:$4 sm:$0xff]  }
  0x69   :  { %v214_v37 = vadd.f32 %v3340_v28, %v3336_v24  ;;  %v3348_v38 = vadd.f32 %v189_v35, %v181_v31  ;;  %v3350_v39 = vadd.f32 %v190_v36, %v182_v34  ;;  %v310_v40 = vadd.f32 %v3344_v33, %v3342_v32  ;;  %v2739_v42 = vld [vmem:[#allocation10 + $0x74] ss:$8 sps:$4 sm:$0xff]   ;;  %v2741_v43 = vld [vmem:[#allocation10 + $0x70] ss:$8 sps:$4 sm:$0xff]   ;;  %v3360_v48 = vld [vmem:[#allocation11 + $0x64] ss:$8 sps:$4 sm:$0xff]  }
  0x6a   :  { %209 = vadd.xlane.f32.xlu0 %v208_v27  ;;  %612 = vmatprep.subr.bf16.mxu1 %v2739_v42  ;;  %v3356_v45 = vld [vmem:[#allocation11 + $0x74] ss:$8 sps:$4 sm:$0xff]   ;;  %v3358_v46 = vld [vmem:[#allocation11 + $0x70] ss:$8 sps:$4 sm:$0xff]   ;;  %v3364_v50 = vld [vmem:[#allocation11 + $0x60] ss:$8 sps:$4 sm:$0xff]  }
  0x6b   :  { %v313_v41 = vadd.f32 %v3350_v39, %v3348_v38  ;;  %613 = vmatpush1.bf16.msra.mxu1 %v2741_v43  ;;  %v2745_v49 = vld [vmem:[#allocation10 + $0x54] ss:$8 sps:$4 sm:$0xff]   ;;  %926 = vmatprep.subr.bf16.mxu0 %v3356_v45  ;;  %v2747_v52 = vld [vmem:[#allocation10 + $0x50] ss:$8 sps:$4 sm:$0xff]   ;;  %v2751_v53 = vld [vmem:[#allocation10 + $0x44] ss:$8 sps:$4 sm:$0xff]  }
  0x6c   :  { %215 = vadd.xlane.f32.xlu1 %v214_v37  ;;  %614 = vmatprep.subr.bf16.mxu1 %v2742_v44  ;;  %v3367_v51 = vld [vmem:[#allocation11 + $0x54] ss:$8 sps:$4 sm:$0xff]   ;;  %v2753_v54 = vld [vmem:[#allocation10 + $0x40] ss:$8 sps:$4 sm:$0xff]   ;;  %v3370_v55 = vld [vmem:[#allocation11 + $0x50] ss:$8 sps:$4 sm:$0xff]  }
  0x6d   :  { %927 = vmatpush1.bf16.msra.mxu0 %v3358_v46  ;;  %v2757_v56 = vld [vmem:[#allocation10 + $0x34] ss:$8 sps:$4 sm:$0xff]   ;;  %v3373_v57 = vld [vmem:[#allocation11 + $0x44] ss:$8 sps:$4 sm:$0xff]   ;;  %v3375_v58 = vld [vmem:[#allocation11 + $0x40] ss:$8 sps:$4 sm:$0xff]  }
  0x6e   :  { %311 = vadd.xlane.f32.xlu0 %v310_v40  ;;  %928 = vmatprep.subr.bf16.mxu0 %v3360_v48  ;;  %v3377_v59 = vld [vmem:[#allocation11 + $0x34] ss:$8 sps:$4 sm:$0xff]   ;;  %v2759_v60 = vld [vmem:[#allocation10 + $0x30] ss:$8 sps:$4 sm:$0xff]   ;;  %v2763_v61 = vld [vmem:[#allocation10 + $0x24] ss:$8 sps:$4 sm:$0xff]  }
  0x6f   :  { %615 = vmatpush1.bf16.msra.mxu1 %v2744_v47  ;;  %v3381_v62 = vld [vmem:[#allocation11 + $0x30] ss:$8 sps:$4 sm:$0xff]   ;;  %v3383_v63 = vld [vmem:[#allocation11 + $0x24] ss:$8 sps:$4 sm:$0xff]   ;;  %v2765_v0 = vld [vmem:[#allocation10 + $0x20] ss:$8 sps:$4 sm:$0xff]  }
  0x70   :  { %314 = vadd.xlane.f32.xlu1 %v313_v41  ;;  %616 = vmatprep.subr.bf16.mxu1 %v2745_v49  ;;  %v2769_v1 = vld [vmem:[#allocation10 + $0x14] ss:$8 sps:$4 sm:$0xff]   ;;  %v3387_v2 = vld [vmem:[#allocation11 + $0x20] ss:$8 sps:$4 sm:$0xff]   ;;  %v2771_v5 = vld [vmem:[#allocation10 + $0x10] ss:$8 sps:$4 sm:$0xff]  }
  0x71   :  { %929 = vmatpush1.bf16.msra.mxu0 %v3364_v50  ;;  %v3389_v3 = vld [vmem:[#allocation11 + $0x14] ss:$8 sps:$4 sm:$0xff]   ;;  %v2775_v6 = vld [vmem:[#allocation10 + $0x4] ss:$8 sps:$4 sm:$0xff]   ;;  %v2777_v8 = vld [vmem:[#allocation10] ss:$8 sps:$4 sm:$0xff]  }
  0x72   :  { %930 = vmatprep.subr.bf16.mxu0 %v3367_v51  ;;  %v2781_v9 = vld [vmem:[#allocation10 + $0xf4] ss:$8 sps:$4 sm:$0xff]   ;;  %v2783_v10 = vld [vmem:[#allocation10 + $0xf0] ss:$8 sps:$4 sm:$0xff]   ;;  %v183_v37 = vld [vmem:[#allocation5 + $0x20] sm:$0xff] }
  0x73   :  { %617 = vmatpush1.bf16.msra.mxu1 %v2747_v52  ;;  %v184_v43 = vld [vmem:[#allocation5 + $0x28] sm:$0xff]  ;;  %v191_v44 = vld [vmem:[#allocation8 + $0x20] sm:$0xff] }
  0x74   :  { %618 = vmatprep.subr.bf16.mxu1 %v2751_v53  ;;  %v192_v47 = vld [vmem:[#allocation8 + $0x28] sm:$0xff] }
  0x75   :  { %931 = vmatpush1.bf16.msra.mxu0 %v3370_v55 }
  0x76   :  { %932 = vmatprep.subr.bf16.mxu0 %v3373_v57 }
  0x77   :  { %619 = vmatpush1.bf16.msra.mxu1 %v2753_v54 }
  0x78   :  { %620 = vmatprep.subr.bf16.mxu1 %v2757_v56 }
  0x79   :  { %933 = vmatpush1.bf16.msra.mxu0 %v3375_v58 }
  0x7a   :  { %934 = vmatprep.subr.bf16.mxu0 %v3377_v59 }
  0x7b   :  { %621 = vmatpush1.bf16.msra.mxu1 %v2759_v60 }
  0x7c   :  { %622 = vmatprep.subr.bf16.mxu1 %v2763_v61  ;;  %v3447_v61 = vadd.f32 %v191_v44, %v183_v37  ;;  %v2799_v37 = vld [vmem:[#allocation10 + $0xc4] ss:$8 sps:$4 sm:$0xff]   ;;  %v3490_v44 = vld [vmem:[#allocation11 + $0xd0] ss:$8 sps:$4 sm:$0xff]  }
  0x7d   :  { %935 = vmatpush1.bf16.msra.mxu0 %v3381_v62 }
  0x7e   :  { %936 = vmatprep.subr.bf16.mxu0 %v3383_v63 }
  0x7f   :  { %623 = vmatpush1.bf16.msra.mxu1 %v2765_v0  ;;  %v3449_v0 = vadd.f32 %v192_v47, %v184_v43  ;;  %v3488_v43 = vld [vmem:[#allocation11 + $0xd4] ss:$8 sps:$4 sm:$0xff]   ;;  %v2811_v47 = vld [vmem:[#allocation10 + $0xa4] ss:$8 sps:$4 sm:$0xff]  }
  0x80   :  { %624 = vmatprep.subr.bf16.mxu1 %v2769_v1 }
  0x81   :  { %937 = vmatpush1.bf16.msra.mxu0 %v3387_v2 }
  0x82   :  { %938 = vmatprep.subr.bf16.mxu0 %v3389_v3 }
  0x83   :  { %625 = vmatpush1.bf16.msra.mxu1 %v2771_v5  ;;  %v185_v5 = vld [vmem:[#allocation5 + $0x30] sm:$0xff] }
  0x84   :  { %626 = vmatprep.subr.bf16.mxu1 %v2775_v6  ;;  %v186_v6 = vld [vmem:[#allocation5 + $0x38] sm:$0xff] }
  0x87   :  { %627 = vmatpush1.bf16.msra.mxu1 %v2777_v8  ;;  %v193_v8 = vld [vmem:[#allocation8 + $0x30] sm:$0xff] }
  0x88   :  { %628 = vmatprep.subr.bf16.mxu1 %v2781_v9  ;;  %v194_v9 = vld [vmem:[#allocation8 + $0x38] sm:$0xff] }
  0x8b   :  { %629 = vmatpush2.bf16.msra.mxu1 %v2783_v10 }
  0xef   :  { %v207_v13 = vpop.xlane.xlu0 %206 }
  0xf0   :  { %v218_v14 = vmul.f32 0.00390625, %v207_v13  ;;  %v316_v13 = vadd.f32 %v3449_v0, %v3447_v61 }
  0xf1   :  { %v213_v15 = vpop.xlane.xlu1 %212 }
  0xf2   :  { %v220_v16 = vmul.f32 0.00390625, %v213_v15  ;;  %v3396_v19 = vsub.f32 %v3320_v4, %v218_v14  ;;  %v3399_v20 = vsub.f32 %v3322_v7, %v218_v14  ;;  %v3461_v15 = vadd.f32 %v193_v8, %v185_v5  ;;  %v2823_v5 = vld [vmem:[#allocation10 + $0x84] ss:$8 sps:$4 sm:$0xff]   ;;  %v3513_v8 = vld [vmem:[#allocation11 + $0x94] ss:$8 sps:$4 sm:$0xff]  }
  0xf3   :  { %v210_v23 = vpop.xlane.xlu0 %209 }
  0xf4   :  { %v3402_v21 = vsub.f32 %v3324_v11, %v220_v16  ;;  %v3405_v22 = vsub.f32 %v3326_v12, %v220_v16  ;;  %v219_v25 = vmul.f32 0.00390625, %v210_v23  ;;  %v230_v27 = vmul.f32 %v3396_v19, %v3396_v19  ;;  %v3465_v23 = vld [vmem:[#allocation11 + $0x10] ss:$8 sps:$4 sm:$0xff]  }
  0xf5   :  { %v216_v26 = vpop.xlane.xlu1 %215  ;;  %v231_v29 = vmul.f32 %v3399_v20, %v3399_v20  ;;  %v3463_v16 = vadd.f32 %v194_v9, %v186_v6  ;;  %939 = vmatpush1.bf16.msra.mxu0 %v3465_v23  ;;  %v3508_v6 = vld [vmem:[#allocation11 + $0xa0] ss:$8 sps:$4 sm:$0xff]   ;;  %v3515_v9 = vld [vmem:[#allocation11 + $0x90] ss:$8 sps:$4 sm:$0xff]  }
  0xf6   :  { %v221_v4 = vmul.f32 0.00390625, %v216_v26  ;;  %v234_v7 = vmul.f32 %v3402_v21, %v3402_v21  ;;  %v235_v11 = vmul.f32 %v3405_v22, %v3405_v22  ;;  %v3416_v30 = vsub.f32 %v3330_v17, %v219_v25  ;;  %v2789_v26 = vld [vmem:[#allocation10 + $0xe0] ss:$8 sps:$4 sm:$0xff]  }
  0xf7   :  { %v3419_v12 = vsub.f32 %v3332_v18, %v219_v25  ;;  %v238_v31 = vadd.f32 %v231_v29, %v230_v27  ;;  %v312_v36 = vpop.xlane.xlu0 %311  ;;  %v2787_v25 = vld [vmem:[#allocation10 + $0xe4] ss:$8 sps:$4 sm:$0xff]   ;;  %v319_v29 = vadd.f32 %v3463_v16, %v3461_v15 }
  0xf8   :  { %v3422_v34 = vsub.f32 %v3336_v24, %v221_v4  ;;  %v3425_v35 = vsub.f32 %v3340_v28, %v221_v4  ;;  %v322_v40 = vmul.f32 0.00390625, %v312_v36  ;;  %v244_v42 = vadd.f32 %v235_v11, %v234_v7  ;;  %v3468_v27 = vld [vmem:[#allocation11 + $0x4] ss:$8 sps:$4 sm:$0xff]   ;;  %630 = vmatprep.subr.bf16.mxu1 %v2787_v25  ;;  %v3473_v4 = vld [vmem:[#allocation11] ss:$8 sps:$4 sm:$0xff]  }
  0xf9   :  { %239 = vadd.xlane.f32.xlu0 %v238_v31  ;;  %v315_v41 = vpop.xlane.xlu1 %314  ;;  %v232_v17 = vmul.f32 %v3416_v30, %v3416_v30  ;;  %v233_v18 = vmul.f32 %v3419_v12, %v3419_v12  ;;  %940 = vmatprep.subr.bf16.mxu0 %v3468_v27  ;;  %v2793_v7 = vld [vmem:[#allocation10 + $0xd4] ss:$8 sps:$4 sm:$0xff]   ;;  %v2795_v11 = vld [vmem:[#allocation10 + $0xd0] ss:$8 sps:$4 sm:$0xff]  }
  0xfa   :  { %v323_v24 = vmul.f32 0.00390625, %v315_v41  ;;  %v236_v28 = vmul.f32 %v3422_v34, %v3422_v34  ;;  %v237_v49 = vmul.f32 %v3425_v35, %v3425_v35  ;;  %v3436_v52 = vsub.f32 %v3342_v32, %v322_v40  ;;  %631 = vmatpush2.bf16.msra.mxu1 %v2789_v26  ;;  %941 = vmatpush1.bf16.msra.mxu0 %v3473_v4  ;;  %v3476_v31 = vld [vmem:[#allocation11 + $0xf4] ss:$8 sps:$4 sm:$0xff]   ;;  %v3478_v36 = vld [vmem:[#allocation11 + $0xf0] ss:$8 sps:$4 sm:$0xff]  }
  0xfb   :  { %v3439_v53 = vsub.f32 %v3344_v33, %v322_v40  ;;  %v241_v54 = vadd.f32 %v233_v18, %v232_v17  ;;  %632 = vmatprep.subr.bf16.mxu1 %v2793_v7  ;;  %942 = vmatprep.subr.bf16.mxu0 %v3476_v31  ;;  %v2801_v40 = vld [vmem:[#allocation10 + $0xc0] ss:$8 sps:$4 sm:$0xff]   ;;  %v3482_v41 = vld [vmem:[#allocation11 + $0xe4] ss:$8 sps:$4 sm:$0xff]   ;;  %v2805_v17 = vld [vmem:[#allocation10 + $0xb4] ss:$8 sps:$4 sm:$0xff]  }
  0xfc   :  { %v3442_v56 = vsub.f32 %v3348_v38, %v323_v24  ;;  %v3445_v60 = vsub.f32 %v3350_v39, %v323_v24  ;;  %v247_v1 = vadd.f32 %v237_v49, %v236_v28  ;;  %v334_v32 = vmul.f32 %v3436_v52, %v3436_v52  ;;  %v2807_v18 = vld [vmem:[#allocation10 + $0xb0] ss:$8 sps:$4 sm:$0xff]   ;;  %v2813_v24 = vld [vmem:[#allocation10 + $0xa0] ss:$8 sps:$4 sm:$0xff]   ;;  %v3494_v28 = vld [vmem:[#allocation11 + $0xc4] ss:$8 sps:$4 sm:$0xff]  }
  0xfd   :  { %245 = vadd.xlane.f32.xlu0 %v244_v42  ;;  %242 = vadd.xlane.f32.xlu1 %v241_v54  ;;  %v335_v33 = vmul.f32 %v3439_v53, %v3439_v53  ;;  %v3484_v42 = vld [vmem:[#allocation11 + $0xe0] ss:$8 sps:$4 sm:$0xff]   ;;  %v2817_v54 = vld [vmem:[#allocation10 + $0x94] ss:$8 sps:$4 sm:$0xff]  }
  0xfe   :  { %v336_v38 = vmul.f32 %v3442_v56, %v3442_v56  ;;  %v337_v39 = vmul.f32 %v3445_v60, %v3445_v60  ;;  %633 = vmatpush2.bf16.msra.mxu1 %v2795_v11  ;;  %943 = vmatpush2.bf16.msra.mxu0 %v3478_v36  ;;  %v3496_v49 = vld [vmem:[#allocation11 + $0xc0] ss:$8 sps:$4 sm:$0xff]  }
  0xff   :  { %v342_v10 = vadd.f32 %v335_v33, %v334_v32  ;;  %634 = vmatprep.subr.bf16.mxu1 %v2799_v37  ;;  %944 = vmatprep.subr.bf16.mxu0 %v3482_v41  ;;  %v3499_v32 = vld [vmem:[#allocation11 + $0xb4] ss:$8 sps:$4 sm:$0xff]   ;;  %v3502_v33 = vld [vmem:[#allocation11 + $0xb0] ss:$8 sps:$4 sm:$0xff]  }
 0x100   :  { %v345_v14 = vadd.f32 %v337_v39, %v336_v38  ;;  %v2825_v38 = vld [vmem:[#allocation10 + $0x80] ss:$8 sps:$4 sm:$0xff]   ;;  %v3505_v39 = vld [vmem:[#allocation11 + $0xa4] ss:$8 sps:$4 sm:$0xff]  }
 0x101   :  { %248 = vadd.xlane.f32.xlu1 %v247_v1  ;;  %343 = vadd.xlane.f32.xlu0 %v342_v10  ;;  %v2819_v1 = vld [vmem:[#allocation10 + $0x90] ss:$8 sps:$4 sm:$0xff]   ;;  %v3519_v10 = vld [vmem:[#allocation11 + $0x84] ss:$8 sps:$4 sm:$0xff]  }
 0x102   :  { %635 = vmatpush2.bf16.msra.mxu1 %v2801_v40  ;;  %945 = vmatpush2.bf16.msra.mxu0 %v3484_v42  ;;  %4067 = vst [vmem:[#allocation23_spill] sm:$0xff] %v3519_v10  ;;  %v271_v40 = vlaneseq }
 0x103   :  { %636 = vmatprep.subr.bf16.mxu1 %v2805_v17  ;;  %946 = vmatprep.subr.bf16.mxu0 %v3488_v43 }
 0x105   :  { %346 = vadd.xlane.f32.xlu1 %v345_v14  ;;  %317 = vadd.xlane.f32.xlu0 %v316_v13  ;;  %v3521_v13 = vld [vmem:[#allocation11 + $0x80] ss:$8 sps:$4 sm:$0xff]   ;;  %v3525_v14 = vld [vmem:[#allocation13 + $0x74] ss:$8 sps:$4 sm:$0xff]  }
 0x106   :  { %637 = vmatpush2.bf16.msra.mxu1 %v2807_v18  ;;  %947 = vmatpush2.bf16.msra.mxu0 %v3490_v44  ;;  %4068 = vst [vmem:[#allocation24_spill] sm:$0xff] %v3521_v13  ;;  %4069 = vst [vmem:[#allocation25_spill] sm:$0xff] %v3525_v14 }
 0x107   :  { %638 = vmatprep.subr.bf16.mxu1 %v2811_v47  ;;  %948 = vmatprep.subr.bf16.mxu0 %v3494_v28 }
 0x109   :  { %320 = vadd.xlane.f32.xlu1 %v319_v29 }
 0x10a   :  { %639 = vmatpush2.bf16.msra.mxu1 %v2813_v24  ;;  %949 = vmatpush2.bf16.msra.mxu0 %v3496_v49 }
 0x10b   :  { %640 = vmatprep.subr.bf16.mxu1 %v2817_v54  ;;  %950 = vmatprep.subr.bf16.mxu0 %v3499_v32 }
 0x10e   :  { %641 = vmatpush2.bf16.msra.mxu1 %v2819_v1  ;;  %951 = vmatpush2.bf16.msra.mxu0 %v3502_v33 }
 0x10f   :  { %642 = vmatprep.subr.bf16.mxu1 %v2823_v5  ;;  %952 = vmatprep.subr.bf16.mxu0 %v3505_v39  ;;  %v272_v5 = vshrl.u32 %v271_v40, 7  ;;  %v203_v40 = vld [vmem:[%s4051_s4] sm:$0x3] }
 0x112   :  { %643 = vmatpush2.bf16.msra.mxu1 %v2825_v38  ;;  %953 = vmatpush2.bf16.msra.mxu0 %v3508_v6 }
 0x113   :  { %869 = vmatprep.subr.bf16.mxu1 %v3356_v45  ;;  %954 = vmatprep.subr.bf16.mxu0 %v3513_v8 }
 0x116   :  { %955 = vmatpush2.bf16.msra.mxu0 %v3515_v9 }
 0x117   :  { %956 = vmatprep.subr.bf16.mxu0 %v3519_v10 }
 0x11a   :  { %957 = vmatpush2.bf16.msra.mxu0 %v3521_v13 }
 0x11b   :  { %1232 = vmatprep.subr.bf16.mxu0 %v3525_v14 }
 0x182   :  { %v240_v45 = vpop.xlane.xlu0 %239 }
 0x183   :  { %v250_v25 = vmul.f32 0.00390625, %v240_v45 }
 0x185   :  { %v254_v26 = vadd.f32 1e-05, %v250_v25 }
 0x186   :  { %v243_v29 = vpop.xlane.xlu1 %242  ;;  %v246_v7 = vpop.xlane.xlu0 %245 }
 0x187   :  { %2931 = vrsqrt.f32 %v254_v26  ;;  %v251_v11 = vmul.f32 0.00390625, %v243_v29  ;;  %v252_v37 = vmul.f32 0.00390625, %v246_v7  ;;  %v3528_v26 = vsub.s32 1, %v272_v5 }
 0x188   :  { %v3530_v29 = vsub.s32 0, %v272_v5 }
 0x189   :  { %v255_v17 = vadd.f32 1e-05, %v251_v11  ;;  %v256_v18 = vadd.f32 1e-05, %v252_v37 }
 0x18a   :  { %v249_v47 = vpop.xlane.xlu1 %248  ;;  %v344_v24 = vpop.xlane.xlu0 %343 }
 0x18b   :  { %2933 = vrsqrt.f32 %v255_v17  ;;  %v253_v54 = vmul.f32 0.00390625, %v249_v47  ;;  %v354_v1 = vmul.f32 0.00390625, %v344_v24  ;;  %v274_v24 = vrot.slane %v203_v40, %v3530_v29 }
 0x18c   :  { %2935 = vrsqrt.f32 %v256_v18 }
 0x18d   :  { %v257_v38 = vadd.f32 1e-05, %v253_v54  ;;  %v358_v14 = vadd.f32 1e-05, %v354_v1  ;;  %v204_v1 = vld [vmem:[%s4052_s5] sm:$0x3] }
 0x18e   :  { %v347_v13 = vpop.xlane.xlu1 %346  ;;  %v318_v45 = vpop.xlane.xlu0 %317 }
 0x18f   :  { %2937 = vrsqrt.f32 %v257_v38  ;;  %v355_v25 = vmul.f32 0.00390625, %v347_v13  ;;  %v324_v10 = vmul.f32 0.00390625, %v318_v45 }
 0x190   :  { %2939 = vrsqrt.f32 %v358_v14 }
 0x191   :  { %v359_v7 = vadd.f32 1e-05, %v355_v25  ;;  %v3533_v11 = vsub.f32 %v3447_v61, %v324_v10  ;;  %v3536_v37 = vsub.f32 %v3449_v0, %v324_v10  ;;  %v278_v61 = vrot.slane %v203_v40, %v3528_v26 }
 0x192   :  { %v321_v17 = vpop.xlane.xlu1 %320 }
 0x193   :  { %4070 = vst [vmem:[#allocation26_spill] sm:$0xff] %v3533_v11  ;;  %2941 = vrsqrt.f32 %v359_v7  ;;  %v325_v13 = vmul.f32 0.00390625, %v321_v17  ;;  %v338_v14 = vmul.f32 %v3533_v11, %v3533_v11  ;;  %v339_v18 = vmul.f32 %v3536_v37, %v3536_v37 }
 0x194   :  { %v2932_v47 = vpop.eup %2931  ;;  %v293_v17 = vrot.slane %v204_v1, %v3530_v29 }
 0x195   :  { %v3548_v0 = vsub.f32 %v3461_v15, %v325_v13  ;;  %v3551_v10 = vsub.f32 %v3463_v16, %v325_v13  ;;  %v348_v54 = vadd.f32 %v339_v18, %v338_v14  ;;  %v263_v5 = vmul.f32 %v2932_v47, %v3399_v20  ;;  %v308_v20 = vld [vmem:[%s4053_s6] sm:$0x3] }
 0x196   :  { %v262_v38 = vmul.f32 %v2932_v47, %v3396_v19  ;;  %v297_v16 = vrot.slane %v204_v1, %v3528_v26 }
 0x197   :  { %4071 = vst [vmem:[#allocation27_spill] sm:$0xff] %v3548_v0  ;;  %4072 = vst [vmem:[#allocation28_spill] sm:$0xff] %v3551_v10  ;;  %349 = vadd.xlane.f32.xlu0 %v348_v54  ;;  %v340_v45 = vmul.f32 %v3548_v0, %v3548_v0  ;;  %v341_v15 = vmul.f32 %v3551_v10, %v3551_v10  ;;  %v282_v7 = vmul.f32 %v278_v61, %v263_v5 }
 0x198   :  { %v2934_v25 = vpop.eup %2933  ;;  %v281_v40 = vmul.f32 %v274_v24, %v262_v38  ;;  %v3571_v0 = vrot.slane %v308_v20, %v3530_v29 }
 0x199   :  { %v2936_v13 = vpop.eup %2935  ;;  %v351_v19 = vadd.f32 %v341_v15, %v340_v45  ;;  %v265_v14 = vmul.f32 %v2934_v25, %v3419_v12  ;;  %v264_v18 = vmul.f32 %v2934_v25, %v3416_v30  ;;  %v3573_v1 = vadd.f32 %v297_v16, %v282_v7  ;;  %v309_v12 = vld [vmem:[%s4054_s7] sm:$0x3] }
 0x19a   :  { %v267_v47 = vmul.f32 %v2936_v13, %v3405_v22  ;;  %v3575_v10 = vadd.f32 %v293_v17, %v281_v40  ;;  %v3581_v30 = vrot.slane %v308_v20, %v3528_v26 }
 0x19b   :  { %352 = vadd.xlane.f32.xlu1 %v351_v19  ;;  %v284_v54 = vmul.f32 %v278_v61, %v265_v14  ;;  %v283_v5 = vmul.f32 %v274_v24, %v264_v18  ;;  %v266_v19 = vmul.f32 %v2936_v13, %v3402_v21  ;;  %v3607_v21 = vrot.slane %v309_v12, %v3528_v26 }
 0x19c   :  { %v2938_v38 = vpop.eup %2937  ;;  %v286_v11 = vmul.f32 %v278_v61, %v267_v47 }
 0x19d   :  { %v2940_v22 = vpop.eup %2939  ;;  %v3583_v45 = vadd.f32 %v297_v16, %v284_v54  ;;  %v3585_v15 = vadd.f32 %v293_v17, %v283_v5  ;;  %v269_v25 = vmul.f32 %v2938_v38, %v3425_v35  ;;  %v268_v7 = vmul.f32 %v2938_v38, %v3422_v34 }
 0x19e   :  { %v367_v40 = vmul.f32 %v2940_v22, %v3439_v53  ;;  %v366_v14 = vmul.f32 %v2940_v22, %v3436_v52  ;;  %v3601_v54 = vrot.slane %v309_v12, %v3530_v29  ;;  %v3603_v34 = vadd.f32 %v297_v16, %v286_v11 }
 0x19f   :  { %v3594_v18 = vpack.c.bf16 %v3583_v45, %v3573_v1  ;;  %v3598_v20 = vpack.c.bf16 %v3585_v15, %v3575_v10  ;;  %v288_v47 = vmul.f32 %v278_v61, %v269_v25  ;;  %v287_v52 = vmul.f32 %v274_v24, %v268_v7 }
 0x1a0   :  { %v2942_v35 = vpop.eup %2941  ;;  %v386_v53 = vmul.f32 %v3581_v30, %v367_v40  ;;  %v385_v38 = vmul.f32 %v3571_v0, %v366_v14  ;;  %v285_v11 = vmul.f32 %v274_v24, %v266_v19  ;;  %v3658_v14 = vld [vmem:[#allocation13 + $0x54] ss:$8 sps:$4 sm:$0xff]  }
 0x1a1   :  { %644 = vmatprep.mubr.bf16.mxu1 %v3594_v18  ;;  %v3610_v13 = vadd.f32 %v297_v16, %v288_v47  ;;  %v369_v5 = vmul.f32 %v2942_v35, %v3445_v60  ;;  %v368_v61 = vmul.f32 %v2942_v35, %v3442_v56  ;;  %v3624_v60 = vadd.f32 %v293_v17, %v287_v52  ;;  %v2862_v47 = vld [vmem:[#allocation13 + $0xe0] ss:$8 sps:$4 sm:$0xff]   ;;  %v2870_v35 = vld [vmem:[#allocation13 + $0xc4] ss:$8 sps:$4 sm:$0xff]   ;;  %v2879_v52 = vld [vmem:[#allocation13 + $0x94] ss:$8 sps:$4 sm:$0xff]  }
 0x1a2   :  { %645 = vmatmul.mubr.bf16.vlgmr.msra.gmra.mxu1 %v3598_v20  ;;  %v405_v56 = vadd.f32 %v3607_v21, %v386_v53  ;;  %v3631_v7 = vadd.f32 %v293_v17, %v285_v11  ;;  %v3646_v17 = vld [vmem:[#allocation13 + $0x70] ss:$8 sps:$4 sm:$0xff]   ;;  %v4073_v53 = vld [vmem:[#allocation23_spill] sm:$0xff] }
 0x1a3   :  { %870 = vmatpush1.bf16.msra.mxu1 %v3358_v46  ;;  %v3619_v12 = vpack.c.bf16 %v3610_v13, %v3603_v34  ;;  %v388_v22 = vmul.f32 %v3581_v30, %v369_v5  ;;  %v387_v16 = vmul.f32 %v3571_v0, %v368_v61  ;;  %v404_v46 = vadd.f32 %v3601_v54, %v385_v38  ;;  %v4075_v5 = vld [vmem:[#allocation25_spill] sm:$0xff] }
 0x1a4   :  { %871 = vmatprep.subr.bf16.mxu1 %v3360_v48  ;;  %v3641_v48 = vpack.c.bf16 %v3624_v60, %v3631_v7 }
 0x1a5   :  { %654 = vmatprep.mubr.bf16.mxu1 %v3619_v12  ;;  %v407_v24 = vadd.f32 %v3607_v21, %v388_v22  ;;  %v406_v25 = vadd.f32 %v3601_v54, %v387_v16 }
 0x1a7   :  { %872 = vmatpush1.bf16.msra.mxu1 %v3364_v50  ;;  %v3634_v40 = vpack.c.bf16 %v407_v24, %v405_v56  ;;  %v3636_v19 = vpack.c.bf16 %v406_v25, %v404_v46  ;;  %v3650_v50 = vld [vmem:[#allocation13 + $0x64] ss:$8 sps:$4 sm:$0xff]   ;;  %v3199_v56 = vmov 0.0  }
 0x1a8   :  { %873 = vmatprep.subr.bf16.mxu1 %v3367_v51  ;;  %v3655_v51 = vld [vmem:[#allocation13 + $0x60] ss:$8 sps:$4 sm:$0xff]  }
 0x1a9   :  { %958 = vmatprep.mubr.bf16.mxu0 %v3634_v40 }
 0x1aa   :  { %655 = vmatmul.mubr.bf16.gmra.mxu1 %v3641_v48  ;;  %959 = vmatmul.mubr.bf16.vlgmr.msra.gmra.mxu0 %v3636_v19 }
 0x1ab   :  { %874 = vmatpush1.bf16.msra.mxu1 %v3370_v55  ;;  %901 = vmatprep.mubr.bf16.mxu1 %v3594_v18  ;;  %v3663_v55 = vld [vmem:[#allocation13 + $0x50] ss:$8 sps:$4 sm:$0xff]  }
 0x1ac   :  { %875 = vmatprep.subr.bf16.mxu1 %v3373_v57  ;;  %1233 = vmatpush1.bf16.msra.mxu0 %v3646_v17  ;;  %v3666_v57 = vld [vmem:[#allocation13 + $0x44] ss:$8 sps:$4 sm:$0xff]  }
 0x1ad   :  { %1234 = vmatprep.subr.bf16.mxu0 %v3650_v50 }
 0x1af   :  { %876 = vmatpush1.bf16.msra.mxu1 %v3375_v58  ;;  %v3671_v58 = vld [vmem:[#allocation13 + $0x40] ss:$8 sps:$4 sm:$0xff]  }
 0x1b0   :  { %877 = vmatprep.subr.bf16.mxu1 %v3377_v59  ;;  %1235 = vmatpush1.bf16.msra.mxu0 %v3655_v51  ;;  %v3674_v59 = vld [vmem:[#allocation13 + $0x34] ss:$8 sps:$4 sm:$0xff]  }
 0x1b1   :  { %1236 = vmatprep.subr.bf16.mxu0 %v3658_v14 }
 0x1b3   :  { %878 = vmatpush1.bf16.msra.mxu1 %v3381_v62  ;;  %v3679_v62 = vld [vmem:[#allocation13 + $0x30] ss:$8 sps:$4 sm:$0xff]  }
 0x1b4   :  { %879 = vmatprep.subr.bf16.mxu1 %v3383_v63  ;;  %1237 = vmatpush1.bf16.msra.mxu0 %v3663_v55  ;;  %v3682_v63 = vld [vmem:[#allocation13 + $0x24] ss:$8 sps:$4 sm:$0xff]  }
 0x1b5   :  { %1238 = vmatprep.subr.bf16.mxu0 %v3666_v57 }
 0x1b7   :  { %880 = vmatpush1.bf16.msra.mxu1 %v3387_v2  ;;  %v3687_v2 = vld [vmem:[#allocation13 + $0x20] ss:$8 sps:$4 sm:$0xff]  }
 0x1b8   :  { %881 = vmatprep.subr.bf16.mxu1 %v3389_v3  ;;  %1239 = vmatpush1.bf16.msra.mxu0 %v3671_v58  ;;  %v3690_v3 = vld [vmem:[#allocation13 + $0x14] ss:$8 sps:$4 sm:$0xff]  }
 0x1b9   :  { %1240 = vmatprep.subr.bf16.mxu0 %v3674_v59 }
 0x1bb   :  { %882 = vmatpush1.bf16.msra.mxu1 %v3465_v23  ;;  %v3695_v23 = vld [vmem:[#allocation13 + $0x10] ss:$8 sps:$4 sm:$0xff]  }
 0x1bc   :  { %883 = vmatprep.subr.bf16.mxu1 %v3468_v27  ;;  %1241 = vmatpush1.bf16.msra.mxu0 %v3679_v62  ;;  %v3698_v27 = vld [vmem:[#allocation13 + $0x4] ss:$8 sps:$4 sm:$0xff]  }
 0x1bd   :  { %1242 = vmatprep.subr.bf16.mxu0 %v3682_v63 }
 0x1bf   :  { %884 = vmatpush1.bf16.msra.mxu1 %v3473_v4  ;;  %v3703_v4 = vld [vmem:[#allocation13] ss:$8 sps:$4 sm:$0xff]  }
 0x1c0   :  { %885 = vmatprep.subr.bf16.mxu1 %v3476_v31  ;;  %1243 = vmatpush1.bf16.msra.mxu0 %v3687_v2  ;;  %v3706_v31 = vld [vmem:[#allocation13 + $0xf4] ss:$8 sps:$4 sm:$0xff]  }
 0x1c1   :  { %1244 = vmatprep.subr.bf16.mxu0 %v3690_v3 }
 0x1c3   :  { %886 = vmatpush2.bf16.msra.mxu1 %v3478_v36  ;;  %v2859_v36 = vld [vmem:[#allocation13 + $0xf0] ss:$8 sps:$4 sm:$0xff]  }
 0x1c4   :  { %887 = vmatprep.subr.bf16.mxu1 %v3482_v41  ;;  %1245 = vmatpush1.bf16.msra.mxu0 %v3695_v23  ;;  %v2864_v41 = vld [vmem:[#allocation13 + $0xe4] ss:$8 sps:$4 sm:$0xff]  }
 0x1c5   :  { %1246 = vmatprep.subr.bf16.mxu0 %v3698_v27 }
 0x1c7   :  { %888 = vmatpush2.bf16.msra.mxu1 %v3484_v42  ;;  %v2867_v42 = vld [vmem:[#allocation13 + $0xd4] ss:$8 sps:$4 sm:$0xff]  }
 0x1c8   :  { %889 = vmatprep.subr.bf16.mxu1 %v3488_v43  ;;  %1247 = vmatpush1.bf16.msra.mxu0 %v3703_v4  ;;  %v2865_v43 = vld [vmem:[#allocation13 + $0xd0] ss:$8 sps:$4 sm:$0xff]  }
 0x1c9   :  { %1248 = vmatprep.subr.bf16.mxu0 %v3706_v31 }
 0x1cb   :  { %890 = vmatpush2.bf16.msra.mxu1 %v3490_v44  ;;  %v2868_v44 = vld [vmem:[#allocation13 + $0xc0] ss:$8 sps:$4 sm:$0xff]  }
 0x1cc   :  { %891 = vmatprep.subr.bf16.mxu1 %v3494_v28  ;;  %1249 = vmatpush2.bf16.msra.mxu0 %v2859_v36  ;;  %v2873_v28 = vld [vmem:[#allocation13 + $0xb4] ss:$8 sps:$4 sm:$0xff]  }
 0x1cd   :  { %1250 = vmatprep.subr.bf16.mxu0 %v2864_v41 }
 0x1cf   :  { %892 = vmatpush2.bf16.msra.mxu1 %v3496_v49  ;;  %v2871_v49 = vld [vmem:[#allocation13 + $0xb0] ss:$8 sps:$4 sm:$0xff]  }
 0x1d0   :  { %893 = vmatprep.subr.bf16.mxu1 %v3499_v32  ;;  %1251 = vmatpush2.bf16.msra.mxu0 %v2862_v47  ;;  %v2876_v32 = vld [vmem:[#allocation13 + $0xa4] ss:$8 sps:$4 sm:$0xff]  }
 0x1d1   :  { %1252 = vmatprep.subr.bf16.mxu0 %v2867_v42 }
 0x1d3   :  { %894 = vmatpush2.bf16.msra.mxu1 %v3502_v33  ;;  %v2874_v33 = vld [vmem:[#allocation13 + $0xa0] ss:$8 sps:$4 sm:$0xff]  }
 0x1d4   :  { %895 = vmatprep.subr.bf16.mxu1 %v3505_v39  ;;  %1253 = vmatpush2.bf16.msra.mxu0 %v2865_v43  ;;  %v4074_v39 = vld [vmem:[#allocation24_spill] sm:$0xff] }
 0x1d5   :  { %1254 = vmatprep.subr.bf16.mxu0 %v2870_v35 }
 0x1d7   :  { %896 = vmatpush2.bf16.msra.mxu1 %v3508_v6  ;;  %v2877_v6 = vld [vmem:[#allocation13 + $0x90] ss:$8 sps:$4 sm:$0xff]  }
 0x1d8   :  { %897 = vmatprep.subr.bf16.mxu1 %v3513_v8  ;;  %1255 = vmatpush2.bf16.msra.mxu0 %v2868_v44  ;;  %v2882_v8 = vld [vmem:[#allocation13 + $0x84] ss:$8 sps:$4 sm:$0xff]  }
 0x1d9   :  { %1256 = vmatprep.subr.bf16.mxu0 %v2873_v28 }
 0x1db   :  { %898 = vmatpush2.bf16.msra.mxu1 %v3515_v9  ;;  %v2880_v9 = vld [vmem:[#allocation13 + $0x80] ss:$8 sps:$4 sm:$0xff]  }
 0x1dc   :  { %899 = vmatprep.subr.bf16.mxu1 %v4073_v53  ;;  %1257 = vmatpush2.bf16.msra.mxu0 %v2871_v49 }
 0x1dd   :  { %1258 = vmatprep.subr.bf16.mxu0 %v2876_v32 }
 0x1df   :  { %900 = vmatpush2.bf16.msra.mxu1 %v4074_v39 }
 0x1e0   :  { %1175 = vmatprep.subr.bf16.mxu1 %v4075_v5  ;;  %1259 = vmatpush2.bf16.msra.mxu0 %v2874_v33 }
 0x1e1   :  { %1260 = vmatprep.subr.bf16.mxu0 %v2879_v52 }
 0x1e2   :  { %902 = vmatmul.mubr.bf16.vlgmr.msra.gmra.mxu1 %v3598_v20 }
 0x1e3   :  { %911 = vmatprep.mubr.bf16.mxu1 %v3619_v12  ;;  %1176 = vmatpush1.bf16.msra.mxu1 %v3646_v17  ;;  %v4077_v17 = vld [vmem:[#allocation28_spill] sm:$0xff] }
 0x1e4   :  { %1177 = vmatprep.subr.bf16.mxu1 %v3650_v50  ;;  %1261 = vmatpush2.bf16.msra.mxu0 %v2877_v6 }
 0x1e5   :  { %1262 = vmatprep.subr.bf16.mxu0 %v2882_v8 }
 0x1e7   :  { %1178 = vmatpush1.bf16.msra.mxu1 %v3655_v51 }
 0x1e8   :  { %1179 = vmatprep.subr.bf16.mxu1 %v3658_v14  ;;  %1263 = vmatpush2.bf16.msra.mxu0 %v2880_v9  ;;  %v4078_v14 = vld [vmem:[#allocation27_spill] sm:$0xff] }
 0x1e9   :  { %2628 = vmatprep.subr.bf16.mxu0 %v3199_v56 }
 0x1ea   :  { %912 = vmatmul.mubr.bf16.gmra.mxu1 %v3641_v48 }
 0x1eb   :  { %1180 = vmatpush1.bf16.msra.mxu1 %v3663_v55  ;;  %1207 = vmatprep.mubr.bf16.mxu1 %v3594_v18 }
 0x1ec   :  { %1181 = vmatprep.subr.bf16.mxu1 %v3666_v57 }
 0x1ef   :  { %1182 = vmatpush1.bf16.msra.mxu1 %v3671_v58 }
 0x1f0   :  { %1183 = vmatprep.subr.bf16.mxu1 %v3674_v59 }
 0x1f3   :  { %1184 = vmatpush1.bf16.msra.mxu1 %v3679_v62 }
 0x1f4   :  { %1185 = vmatprep.subr.bf16.mxu1 %v3682_v63 }
 0x1f7   :  { %1186 = vmatpush1.bf16.msra.mxu1 %v3687_v2 }
 0x1f8   :  { %1187 = vmatprep.subr.bf16.mxu1 %v3690_v3 }
 0x1fb   :  { %1188 = vmatpush1.bf16.msra.mxu1 %v3695_v23 }
 0x1fc   :  { %1189 = vmatprep.subr.bf16.mxu1 %v3698_v27 }
 0x1ff   :  { %1190 = vmatpush1.bf16.msra.mxu1 %v3703_v4 }
 0x200   :  { %1191 = vmatprep.subr.bf16.mxu1 %v3706_v31 }
 0x203   :  { %1192 = vmatpush2.bf16.msra.mxu1 %v2859_v36 }
 0x204   :  { %1193 = vmatprep.subr.bf16.mxu1 %v2864_v41 }
 0x207   :  { %1194 = vmatpush2.bf16.msra.mxu1 %v2862_v47 }
 0x208   :  { %1195 = vmatprep.subr.bf16.mxu1 %v2867_v42 }
 0x20b   :  { %1196 = vmatpush2.bf16.msra.mxu1 %v2865_v43 }
 0x20c   :  { %1197 = vmatprep.subr.bf16.mxu1 %v2870_v35 }
 0x20f   :  { %1198 = vmatpush2.bf16.msra.mxu1 %v2868_v44 }
 0x210   :  { %1199 = vmatprep.subr.bf16.mxu1 %v2873_v28 }
 0x213   :  { %1200 = vmatpush2.bf16.msra.mxu1 %v2871_v49 }
 0x214   :  { %1201 = vmatprep.subr.bf16.mxu1 %v2876_v32 }
 0x217   :  { %1202 = vmatpush2.bf16.msra.mxu1 %v2874_v33 }
 0x218   :  { %1203 = vmatprep.subr.bf16.mxu1 %v2879_v52 }
 0x21b   :  { %1204 = vmatpush2.bf16.msra.mxu1 %v2877_v6 }
 0x21c   :  { %1205 = vmatprep.subr.bf16.mxu1 %v2882_v8 }
 0x21f   :  { %1206 = vmatpush2.bf16.msra.mxu1 %v2880_v9 }
 0x220   :  { %v350_v18 = vpop.xlane.xlu0 %349  ;;  %2646 = vmatprep.subr.bf16.mxu1 %v3199_v56 }
 0x221   :  { %v356_v61 = vmul.f32 0.00390625, %v350_v18 }
 0x222   :  { %1208 = vmatmul.mubr.bf16.vlgmr.msra.gmra.mxu1 %v3598_v20 }
 0x223   :  { %v360_v38 = vadd.f32 1e-05, %v356_v61  ;;  %1217 = vmatprep.mubr.bf16.mxu1 %v3619_v12  ;;  %v4076_v12 = vld [vmem:[#allocation26_spill] sm:$0xff] }
 0x224   :  { %v353_v11 = vpop.xlane.xlu1 %352 }
 0x225   :  { %2943 = vrsqrt.f32 %v360_v38  ;;  %v357_v22 = vmul.f32 0.00390625, %v353_v11 }
 0x227   :  { %v361_v16 = vadd.f32 1e-05, %v357_v22 }
 0x229   :  { %2945 = vrsqrt.f32 %v361_v16 }
 0x22a   :  { %1218 = vmatmul.mubr.bf16.gmra.mxu1 %v3641_v48 }
 0x22b   :  { %2648 = vmatprep.mubr.msk.bf16.mxu1 %vm3200_vm0, %v3199_v56 }
 0x232   :  { %v2944_v20 = vpop.eup %2943 }
 0x233   :  { %v371_v24 = vmul.f32 %v2944_v20, %v3536_v37  ;;  %v370_v46 = vmul.f32 %v2944_v20, %v4076_v12 }
 0x235   :  { %v390_v51 = vmul.f32 %v3581_v30, %v371_v24  ;;  %v389_v57 = vmul.f32 %v3571_v0, %v370_v46 }
 0x236   :  { %v2946_v25 = vpop.eup %2945 }
 0x237   :  { %v373_v50 = vmul.f32 %v2946_v25, %v4077_v17  ;;  %v372_v55 = vmul.f32 %v2946_v25, %v4078_v14  ;;  %v409_v59 = vadd.f32 %v3607_v21, %v390_v51  ;;  %v408_v37 = vadd.f32 %v3601_v54, %v389_v57 }
 0x239   :  { %v392_v48 = vmul.f32 %v3581_v30, %v373_v50  ;;  %v391_v58 = vmul.f32 %v3571_v0, %v372_v55 }
 0x23b   :  { %v411_v62 = vadd.f32 %v3607_v21, %v392_v48  ;;  %v410_v63 = vadd.f32 %v3601_v54, %v391_v58 }
 0x23d   :  { %v419_v2 = vpack.c.bf16 %v411_v62, %v409_v59  ;;  %v418_v3 = vpack.c.bf16 %v410_v63, %v408_v37 }
 0x23f   :  { %968 = vmatprep.mubr.bf16.mxu0 %v419_v2 }
 0x240   :  { %969 = vmatmul.mubr.bf16.gmra.mxu0 %v418_v3 }
 0x241   :  { %1264 = vmatprep.mubr.bf16.mxu0 %v3634_v40 }
 0x248   :  { %1265 = vmatmul.mubr.bf16.vlgmr.msra.gmra.mxu0 %v3636_v19 }
 0x249   :  { %1274 = vmatprep.mubr.bf16.mxu0 %v419_v2 }
 0x250   :  { %1275 = vmatmul.mubr.bf16.gmra.mxu0 %v418_v3 }
 0x251   :  { %2630 = vmatprep.mubr.msk.bf16.mxu0 %vm3200_vm0, %v3199_v56 }
 0x262   :  { %v646_v0 = vpop.f32.mrf.mxu1 }
 0x263   :  { %v665_v9 = vmul.f32 0.088388346, %v646_v0 }
 0x264   :  { %v648_v30 = vpop.f32.mrf.mxu1 }
 0x265   :  { %v666_v27 = vmul.f32 0.088388346, %v648_v30 }
 0x266   :  { %v650_v21 = vpop.f32.mrf.mxu1 }
 0x267   :  { %v667_v6 = vmul.f32 0.088388346, %v650_v21 }
 0x268   :  { %v652_v23 = vpop.f32.mrf.mxu1 }
 0x269   :  { %v668_v4 = vmul.f32 0.088388346, %v652_v23  ;;  %v673_v38 = vpack.c.bf16 %v667_v6, %v665_v9 }
 0x26a   :  { %v656_v54 = vpop.f32.mrf.mxu1  ;;  %v960_v49 = vpop.f32.mrf.mxu0 }
 0x26b   :  { %v3766_v31 = vpack.c.bf16 %v668_v4, %v666_v27  ;;  %v669_v47 = vmul.f32 0.088388346, %v656_v54 }
 0x26c   :  { %v658_v36 = vpop.f32.mrf.mxu1  ;;  %v3774_v39 = vpop.f32.mrf.mxu0 }
 0x26d   :  { %v670_v19 = vmul.f32 0.088388346, %v658_v36 }
 0x26e   :  { %v660_v41 = vpop.f32.mrf.mxu1  ;;  %v964_v18 = vpop.f32.mrf.mxu0 }
 0x26f   :  { %v671_v40 = vmul.f32 0.088388346, %v660_v41  ;;  %v979_v22 = vpack.c.bf16 %v964_v18, %v960_v49 }
 0x270   :  { %v662_v42 = vpop.f32.mrf.mxu1  ;;  %v3813_v58 = vpop.f32.mrf.mxu0 }
 0x271   :  { %v3768_v43 = vpack.c.bf16 %v671_v40, %v669_v47  ;;  %v672_v35 = vmul.f32 0.088388346, %v662_v42 }
 0x273   :  { %v3770_v44 = vpack.c.bf16 %v672_v35, %v670_v19 }
 0x2a2   :  { %v903_v28 = vpop.f32.mrf.mxu1 }
 0x2a4   :  { %v3772_v32 = vpop.f32.mrf.mxu1 }
 0x2a6   :  { %v907_v53 = vpop.f32.mrf.mxu1 }
 0x2a7   :  { %v922_v33 = vpack.c.bf16 %v907_v53, %v903_v28 }
 0x2a8   :  { %v3776_v52 = vpop.f32.mrf.mxu1 }
 0x2a9   :  { %v923_v5 = vpack.c.bf16 %v3776_v52, %v3772_v32  ;;  %2629 = vmatpush3.bf16.xpose.msra.mxu0 %v922_v33 }
 0x2aa   :  { %v3780_v8 = vpop.f32.mrf.mxu1  ;;  %2634 = vmatprep.subr.bf16.mxu0 %v3199_v56 }
 0x2ac   :  { %v3783_v61 = vpop.f32.mrf.mxu1 }
 0x2ae   :  { %v3785_v11 = vpop.f32.mrf.mxu1 }
 0x2af   :  { %v924_v16 = vpack.c.bf16 %v3785_v11, %v3780_v8 }
 0x2b0   :  { %v3789_v20 = vpop.f32.mrf.mxu1  ;;  %2631 = vmatmul.mubr.bf16.vlgmr.msra.gmra.mxu0 %v673_v38 }
 0x2b1   :  { %2635 = vmatpush3.bf16.xpose.msra.mxu0 %v979_v22  ;;  %2636 = vmatprep.mubr.msk.bf16.mxu0 %vm3200_vm0, %v3199_v56 }
 0x2b2   :  { %2640 = vmatprep.subr.bf16.mxu0 %v3199_v56 }
 0x2b8   :  { %2637 = vmatmul.mubr.bf16.vlgmr.msra.gmra.mxu0 %v673_v38 }
 0x2b9   :  { %2642 = vmatprep.mubr.msk.bf16.mxu0 %vm3200_vm0, %v3199_v56 }
 0x2e2   :  { %v1209_v12 = vpop.f32.mrf.mxu1 }
 0x2e4   :  { %v3798_v46 = vpop.f32.mrf.mxu1 }
 0x2e6   :  { %v1213_v25 = vpop.f32.mrf.mxu1 }
 0x2e7   :  { %v1228_v17 = vpack.c.bf16 %v1213_v25, %v1209_v12 }
 0x2e8   :  { %v3800_v50 = vpop.f32.mrf.mxu1 }
 0x2e9   :  { %v1229_v51 = vpack.c.bf16 %v3800_v50, %v3798_v46  ;;  %2647 = vmatpush3.bf16.msra.mxu1 %v1228_v17 }
 0x2ea   :  { %v3804_v14 = vpop.f32.mrf.mxu1  ;;  %2652 = vmatprep.subr.bf16.mxu1 %v3199_v56 }
 0x2ec   :  { %v3807_v55 = vpop.f32.mrf.mxu1 }
 0x2ee   :  { %v3809_v57 = vpop.f32.mrf.mxu1 }
 0x2ef   :  { %v1230_v48 = vpack.c.bf16 %v3809_v57, %v3804_v14 }
 0x2f0   :  { %v3885_v32 = vpop.f32.mrf.mxu1 }
 0x300   :  { %v3815_v59 = vpop.f32.mrf.mxu0 }
 0x302   :  { %v3817_v62 = vpop.f32.mrf.mxu0 }
 0x304   :  { %v3819_v37 = vpop.f32.mrf.mxu0 }
 0x305   :  { %v981_v63 = vpack.c.bf16 %v3819_v37, %v3815_v59 }
 0x306   :  { %v3823_v2 = vpop.f32.mrf.mxu0 }
 0x307   :  { %v982_v3 = vpack.c.bf16 %v3823_v2, %v3817_v62 }
 0x308   :  { %v1266_v0 = vpop.f32.mrf.mxu0 }
 0x30a   :  { %v3827_v30 = vpop.f32.mrf.mxu0 }
 0x30c   :  { %v1270_v21 = vpop.f32.mrf.mxu0 }
 0x30d   :  { %v1285_v23 = vpack.c.bf16 %v1270_v21, %v1266_v0 }
 0x30e   :  { %v3829_v27 = vpop.f32.mrf.mxu0 }
 0x30f   :  { %v1286_v4 = vpack.c.bf16 %v3829_v27, %v3827_v30  ;;  %2641 = vmatpush3.bf16.msra.mxu0 %v1285_v23 }
 0x310   :  { %v1276_v54 = vpop.f32.mrf.mxu0  ;;  %2676 = vmatprep.subr.bf16.mxu0 %v3199_v56 }
 0x312   :  { %v3834_v36 = vpop.f32.mrf.mxu0 }
 0x314   :  { %v1280_v41 = vpop.f32.mrf.mxu0 }
 0x315   :  { %v1287_v47 = vpack.c.bf16 %v1280_v41, %v1276_v54 }
 0x316   :  { %v3836_v40 = vpop.f32.mrf.mxu0 }
 0x317   :  { %v1288_v62 = vpack.c.bf16 %v3836_v40, %v3834_v36 }
 0x370   :  { %v1323_v42 = vpop.f32.mrf.mxu0 }
 0x371   :  { %v1372_v19 = vsel %vm1371_vm1, %v1323_v42, -inf }
 0x372   :  { %1373 = vmax.xlane.f32.xlu0 %v1372_v19  ;;  %v2632_v35 = vpop.f32.mrf.mxu0 }
 0x374   :  { %v1326_v28 = vpop.f32.mrf.mxu0 }
 0x375   :  { %v1375_v49 = vsel %vm1371_vm1, %v1326_v28, -inf }
 0x376   :  { %1376 = vmax.xlane.f32.xlu1 %v1375_v49  ;;  %v2633_v53 = vpop.f32.mrf.mxu0 }
 0x378   :  { %v1364_v33 = vpop.f32.mrf.mxu0 }
 0x379   :  { %v1378_v6 = vsel %vm1371_vm1, %v1364_v33, -inf }
 0x37a   :  { %1379 = vmax.xlane.f32.xlu0 %v1378_v6  ;;  %v2638_v9 = vpop.f32.mrf.mxu0 }
 0x37c   :  { %v1367_v18 = vpop.f32.mrf.mxu0 }
 0x37d   :  { %v1381_v38 = vsel %vm1371_vm1, %v1367_v18, -inf }
 0x37e   :  { %1382 = vmax.xlane.f32.xlu1 %v1381_v38  ;;  %v2639_v22 = vpop.f32.mrf.mxu0 }
 0x3fb   :  { %v1374_v12 = vpop.xlane.xlu0 %1373 }
 0x3ff   :  { %v1377_v25 = vpop.xlane.xlu1 %1376 }
 0x403   :  { %v1380_v17 = vpop.xlane.xlu0 %1379 }
 0x404   :  { %v1384_v0 = vmax.f32 %v1374_v12, %v1380_v17 }
 0x406   :  { %v1386_v21 = vsub.f32 %v1323_v42, %v1384_v0  ;;  %v1392_v23 = vsub.f32 %v1364_v33, %v1384_v0 }
 0x407   :  { %v1383_v54 = vpop.xlane.xlu1 %1382 }
 0x408   :  { %v1388_v41 = vmul.f32 1.442695, %v1386_v21  ;;  %v1385_v19 = vmax.f32 %v1377_v25, %v1383_v54  ;;  %v1394_v35 = vmul.f32 1.442695, %v1392_v23 }
 0x40a   :  { %v1387_v49 = vsub.f32 %v1326_v28, %v1385_v19  ;;  %v1393_v53 = vsub.f32 %v1367_v18, %v1385_v19  ;;  %2947 = vpow2.f32 %v1388_v41  ;;  %v980_v18 = vpack.c.bf16 %v3813_v58, %v3774_v39 }
 0x40b   :  { %2949 = vpow2.f32 %v1394_v35 }
 0x40c   :  { %v1390_v6 = vmul.f32 1.442695, %v1387_v49  ;;  %v1396_v9 = vmul.f32 1.442695, %v1393_v53 }
 0x40e   :  { %2951 = vpow2.f32 %v1390_v6 }
 0x40f   :  { %2953 = vpow2.f32 %v1396_v9 }
 0x417   :  { %v3842_v38 = vpop.eup %2947 }
 0x418   :  { %v3844_v22 = vpop.eup %2949 }
 0x41b   :  { %v3846_v24 = vpop.eup %2951 }
 0x41c   :  { %v3848_v42 = vpop.eup %2953  ;;  %v1412_v33 = vpack.c.bf16 %v3846_v24, %v3842_v38 }
 0x41d   :  { %v1413_v28 = vpack.c.bf16 %v3848_v42, %v3844_v22 }
 0x41e   :  { %2649 = vmatmul.mubr.msk.bf16.vlgmr.msra.gmra.mxu1 %vm1371_vm1, %v1412_v33 }
 0x41f   :  { %2643 = vmatmul.mubr.msk.bf16.vlgmr.msra.gmra.mxu0 %vm1371_vm1, %v1413_v28  ;;  %2653 = vmatpush3.bf16.xpose.msra.mxu1 %v923_v5 }
 0x420   :  { %2677 = vmatpush3.bf16.xpose.msra.mxu0 %v924_v16  ;;  %2654 = vmatprep.mubr.msk.bf16.mxu1 %vm3200_vm0, %v3199_v56 }
 0x421   :  { %2658 = vmatprep.subr.bf16.mxu1 %v3199_v56  ;;  %2678 = vmatprep.mubr.msk.bf16.mxu0 %vm3200_vm0, %v3199_v56 }
 0x422   :  { %2688 = vmatprep.subr.bf16.mxu0 %v3199_v56 }
 0x426   :  { %2655 = vmatmul.mubr.bf16.vlgmr.msra.gmra.mxu1 %v3766_v31 }
 0x427   :  { %2659 = vmatpush3.bf16.xpose.msra.mxu1 %v980_v18  ;;  %2679 = vmatmul.mubr.bf16.vlgmr.msra.gmra.mxu0 %v3768_v43 }
 0x428   :  { %2689 = vmatpush3.bf16.msra.mxu0 %v1287_v47  ;;  %2660 = vmatprep.mubr.msk.bf16.mxu1 %vm3200_vm0, %v3199_v56 }
 0x429   :  { %2664 = vmatprep.subr.bf16.mxu1 %v3199_v56  ;;  %2690 = vmatprep.mubr.msk.bf16.mxu0 %vm3200_vm0, %v3199_v56 }
 0x42a   :  { %2700 = vmatprep.subr.bf16.mxu0 %v3199_v56 }
 0x42e   :  { %2661 = vmatmul.mubr.bf16.vlgmr.msra.gmra.mxu1 %v3766_v31 }
 0x42f   :  { %2665 = vmatpush3.bf16.msra.mxu1 %v1286_v4  ;;  %2666 = vmatprep.mubr.msk.bf16.mxu1 %vm3200_vm0, %v3199_v56 }
 0x430   :  { %2670 = vmatprep.subr.bf16.mxu1 %v3199_v56 }
 0x4de   :  { %v1495_v39 = vpop.f32.mrf.mxu1 }
 0x4df   :  { %v1451_v52 = vpop.f32.mrf.mxu0 }
 0x4e0   :  { %v3887_v5 = vadd.f32 %v1495_v39, %v1451_v52  ;;  %v2650_v8 = vpop.f32.mrf.mxu1 }
 0x4e1   :  { %v2644_v11 = vpop.f32.mrf.mxu0 }
 0x4e2   :  { %v1498_v16 = vpop.f32.mrf.mxu1 }
 0x4e3   :  { %v1454_v58 = vpop.f32.mrf.mxu0 }
 0x4e4   :  { %v3889_v31 = vadd.f32 %v1498_v16, %v1454_v58  ;;  %v2651_v47 = vpop.f32.mrf.mxu1 }
 0x4e5   :  { %v2645_v30 = vpop.f32.mrf.mxu0 }
 0x4e6   :  { %v1540_v27 = vpop.f32.mrf.mxu1 }
 0x4e7   :  { %v3891_v4 = vpop.f32.mrf.mxu0  ;;  %v1588_v12 = vsel %vm1371_vm1, %v1540_v27, -inf }
 0x4e8   :  { %1589 = vmax.xlane.f32.xlu0 %v1588_v12  ;;  %v2656_v25 = vpop.f32.mrf.mxu1  ;;  %v1804_v9 = vsel %vm1371_vm1, %v3891_v4, -inf }
 0x4e9   :  { %v2680_v17 = vpop.f32.mrf.mxu0 }
 0x4ea   :  { %v1543_v0 = vpop.f32.mrf.mxu1 }
 0x4eb   :  { %v3894_v21 = vpop.f32.mrf.mxu0  ;;  %v1591_v23 = vsel %vm1371_vm1, %v1543_v0, -inf }
 0x4ec   :  { %1592 = vmax.xlane.f32.xlu1 %v1591_v23  ;;  %v2657_v54 = vpop.f32.mrf.mxu1  ;;  %v1807_v28 = vsel %vm1371_vm1, %v3894_v21, -inf }
 0x4ed   :  { %v2681_v41 = vpop.f32.mrf.mxu0 }
 0x4ee   :  { %v1581_v19 = vpop.f32.mrf.mxu1 }
 0x4ef   :  { %v1594_v35 = vsel %vm1371_vm1, %v1581_v19, -inf }
 0x4f0   :  { %1595 = vmax.xlane.f32.xlu0 %v1594_v35  ;;  %v2662_v49 = vpop.f32.mrf.mxu1 }
 0x4f2   :  { %v1584_v53 = vpop.f32.mrf.mxu1 }
 0x4f3   :  { %v1597_v6 = vsel %vm1371_vm1, %v1584_v53, -inf }
 0x4f4   :  { %1598 = vmax.xlane.f32.xlu1 %v1597_v6  ;;  %v2663_v33 = vpop.f32.mrf.mxu1  ;;  %1805 = vmax.xlane.f32.xlu0 %v1804_v9 }
 0x4f8   :  { %1808 = vmax.xlane.f32.xlu1 %v1807_v28 }
 0x571   :  { %v1590_v18 = vpop.xlane.xlu0 %1589 }
 0x575   :  { %v1593_v39 = vpop.xlane.xlu1 %1592 }
 0x579   :  { %v1596_v52 = vpop.xlane.xlu0 %1595 }
 0x57a   :  { %v1600_v8 = vmax.f32 %v1590_v18, %v1596_v52 }
 0x57c   :  { %v1608_v11 = vsub.f32 %v1581_v19, %v1600_v8  ;;  %v1602_v17 = vsub.f32 %v1540_v27, %v1600_v8 }
 0x57d   :  { %v1599_v16 = vpop.xlane.xlu1 %1598 }
 0x57e   :  { %v1601_v58 = vmax.f32 %v1593_v39, %v1599_v16  ;;  %v1610_v47 = vmul.f32 1.442695, %v1608_v11  ;;  %v1604_v54 = vmul.f32 1.442695, %v1602_v17  ;;  %v1806_v39 = vpop.xlane.xlu0 %1805 }
 0x580   :  { %v1609_v30 = vsub.f32 %v1584_v53, %v1601_v58  ;;  %v1603_v25 = vsub.f32 %v1543_v0, %v1601_v58  ;;  %2955 = vpow2.f32 %v1610_v47 }
 0x581   :  { %v1809_v52 = vpop.xlane.xlu1 %1808 }
 0x582   :  { %v1612_v12 = vmul.f32 1.442695, %v1609_v30  ;;  %v1606_v23 = vmul.f32 1.442695, %v1603_v25 }
 0x584   :  { %2957 = vpow2.f32 %v1612_v12 }
 0x585   :  { %2959 = vpow2.f32 %v1606_v23 }
 0x586   :  { %2961 = vpow2.f32 %v1604_v54 }
 0x58d   :  { %v3903_v41 = vpop.eup %2955 }
 0x591   :  { %v3905_v35 = vpop.eup %2957 }
 0x592   :  { %v1629_v19 = vpack.c.bf16 %v3905_v35, %v3903_v41  ;;  %v3916_v27 = vpop.eup %2959 }
 0x593   :  { %v3918_v0 = vpop.eup %2961 }
 0x594   :  { %2667 = vmatmul.mubr.msk.bf16.vlgmr.msra.gmra.mxu1 %vm1371_vm1, %v1629_v19  ;;  %v1628_v49 = vpack.c.bf16 %v3916_v27, %v3918_v0 }
 0x595   :  { %2671 = vmatpush3.bf16.msra.mxu1 %v1229_v51  ;;  %2672 = vmatprep.mubr.msk.bf16.mxu1 %vm3200_vm0, %v3199_v56 }
 0x596   :  { %2682 = vmatprep.subr.bf16.mxu1 %v3199_v56 }
 0x59c   :  { %2673 = vmatmul.mubr.msk.bf16.vlgmr.msra.gmra.mxu1 %vm1371_vm1, %v1628_v49 }
 0x59d   :  { %2683 = vmatpush3.bf16.xpose.msra.mxu1 %v981_v63  ;;  %2684 = vmatprep.mubr.msk.bf16.mxu1 %vm3200_vm0, %v3199_v56 }
 0x59e   :  { %2694 = vmatprep.subr.bf16.mxu1 %v3199_v56 }
 0x5a4   :  { %2685 = vmatmul.mubr.bf16.vlgmr.msra.gmra.mxu1 %v3768_v43 }
 0x5a5   :  { %2695 = vmatpush3.bf16.msra.mxu1 %v1230_v48  ;;  %2696 = vmatprep.mubr.msk.bf16.mxu1 %vm3200_vm0, %v3199_v56 }
 0x5a6   :  { %2706 = vmatprep.subr.bf16.mxu1 %v3199_v56 }
 0x654   :  { %v1667_v46 = vpop.f32.mrf.mxu1 }
 0x656   :  { %v2668_v50 = vpop.f32.mrf.mxu1 }
 0x658   :  { %v1670_v51 = vpop.f32.mrf.mxu1 }
 0x65a   :  { %v2669_v59 = vpop.f32.mrf.mxu1 }
 0x65c   :  { %v1711_v37 = vpop.f32.mrf.mxu1 }
 0x65d   :  { %v3936_v63 = vadd.f32 %v1711_v37, %v1667_v46  ;;  %v1231_v37 = vpack.c.bf16 %v3885_v32, %v3807_v55 }
 0x65e   :  { %v2674_v53 = vpop.f32.mrf.mxu1 }
 0x660   :  { %v1714_v6 = vpop.f32.mrf.mxu1 }
 0x661   :  { %v3938_v9 = vadd.f32 %v1714_v6, %v1670_v51 }
 0x662   :  { %v2675_v43 = vpop.f32.mrf.mxu1 }
 0x664   :  { %v1797_v33 = vpop.f32.mrf.mxu1 }
 0x665   :  { %v1810_v14 = vsel %vm1371_vm1, %v1797_v33, -inf }
 0x666   :  { %v2686_v57 = vpop.f32.mrf.mxu1  ;;  %1811 = vmax.xlane.f32.xlu0 %v1810_v14 }
 0x668   :  { %v1800_v48 = vpop.f32.mrf.mxu1 }
 0x669   :  { %v1813_v28 = vsel %vm1371_vm1, %v1800_v48, -inf }
 0x66a   :  { %v2687_v18 = vpop.f32.mrf.mxu1  ;;  %1814 = vmax.xlane.f32.xlu1 %v1813_v28 }
 0x6ef   :  { %v1812_v8 = vpop.xlane.xlu0 %1811 }
 0x6f0   :  { %v1816_v11 = vmax.f32 %v1806_v39, %v1812_v8  ;;  %v1614_v8 = vsel %vm1371_vm1, %v3918_v0, 0.0  ;;  %v1404_v0 = vsel %vm1371_vm1, %v3844_v22, 0.0 }
 0x6f2   :  { %v1818_v16 = vsub.f32 %v3891_v4, %v1816_v11  ;;  %v1824_v58 = vsub.f32 %v1797_v33, %v1816_v11 }
 0x6f3   :  { %v1815_v47 = vpop.xlane.xlu1 %1814 }
 0x6f4   :  { %v1820_v30 = vmul.f32 1.442695, %v1818_v16  ;;  %v1817_v12 = vmax.f32 %v1809_v52, %v1815_v47  ;;  %v1826_v25 = vmul.f32 1.442695, %v1824_v58  ;;  %v1620_v16 = vsel %vm1371_vm1, %v3903_v41, 0.0 }
 0x6f5   :  { %v1617_v58 = vsel %vm1371_vm1, %v3916_v27, 0.0  ;;  %v1398_v47 = vsel %vm1371_vm1, %v3842_v38, 0.0  ;;  %v1407_v27 = vsel %vm1371_vm1, %v3848_v42, 0.0 }
 0x6f6   :  { %v1819_v17 = vsub.f32 %v3894_v21, %v1817_v12  ;;  %v1825_v23 = vsub.f32 %v1800_v48, %v1817_v12  ;;  %2963 = vpow2.f32 %v1820_v30  ;;  %v4079_v21 = vpack.c.bf16 %v3789_v20, %v3783_v61 }
 0x6f7   :  { %2965 = vpow2.f32 %v1826_v25  ;;  %v1623_v30 = vsel %vm1371_vm1, %v3905_v35, 0.0  ;;  %v1401_v12 = vsel %vm1371_vm1, %v3846_v24, 0.0  ;;  %v2885_v35 = vld [vmem:[#allocation14 + $0x74] ss:$8 sps:$4 sm:$0xff]  }
 0x6f8   :  { %v1822_v54 = vmul.f32 1.442695, %v1819_v17  ;;  %v1828_v19 = vmul.f32 1.442695, %v1825_v23 }
 0x6fa   :  { %2967 = vpow2.f32 %v1822_v54 }
 0x6fb   :  { %2969 = vpow2.f32 %v1828_v19 }
 0x703   :  { %v2964_v49 = vpop.eup %2963 }
 0x704   :  { %v3944_v46 = vpop.eup %2965  ;;  %v1830_v41 = vsel %vm1371_vm1, %v2964_v49, 0.0 }
 0x707   :  { %v3946_v50 = vpop.eup %2967 }
 0x708   :  { %v3948_v4 = vpop.eup %2969  ;;  %v1844_v51 = vpack.c.bf16 %v3946_v50, %v2964_v49  ;;  %v1833_v38 = vsel %vm1371_vm1, %v3946_v50, 0.0 }
 0x709   :  { %v1845_v59 = vpack.c.bf16 %v3948_v4, %v3944_v46 }
 0x70a   :  { %2697 = vmatmul.mubr.msk.bf16.vlgmr.msra.gmra.mxu1 %vm1371_vm1, %v1844_v51 }
 0x70b   :  { %2691 = vmatmul.mubr.msk.bf16.vlgmr.msra.gmra.mxu0 %vm1371_vm1, %v1845_v59  ;;  %2707 = vmatpush3.bf16.xpose.msra.mxu1 %v982_v3 }
 0x70c   :  { %2701 = vmatpush3.bf16.xpose.msra.mxu0 %v4079_v21  ;;  %2702 = vmatprep.mubr.msk.bf16.mxu0 %vm3200_vm0, %v3199_v56 }
 0x70d   :  { %2708 = vmatprep.mubr.msk.bf16.mxu1 %vm3200_vm0, %v3199_v56  ;;  %2712 = vmatprep.subr.bf16.mxu0 %v3199_v56 }
 0x70e   :  { %2718 = vmatprep.subr.bf16.mxu1 %v3199_v56 }
 0x712   :  { %2709 = vmatmul.mubr.bf16.vlgmr.msra.gmra.mxu1 %v3770_v44 }
 0x713   :  { %2703 = vmatmul.mubr.bf16.vlgmr.msra.gmra.mxu0 %v3770_v44  ;;  %2719 = vmatpush3.bf16.msra.mxu1 %v1231_v37 }
 0x714   :  { %2713 = vmatpush3.bf16.msra.mxu0 %v1288_v62  ;;  %2714 = vmatprep.mubr.msk.bf16.mxu0 %vm3200_vm0, %v3199_v56 }
 0x715   :  { %2720 = vmatprep.mubr.msk.bf16.mxu1 %vm3200_vm0, %v3199_v56  ;;  %2370 = vmatprep.subr.bf16.mxu0 %v2885_v35 }
 0x7ca   :  { %v1927_v61 = vpop.f32.mrf.mxu1 }
 0x7cb   :  { %v1883_v20 = vpop.f32.mrf.mxu0 }
 0x7cc   :  { %v3977_v2 = vadd.f32 %v1927_v61, %v1883_v20  ;;  %v2698_v55 = vpop.f32.mrf.mxu1 }
 0x7cd   :  { %v2692_v3 = vpop.f32.mrf.mxu0 }
 0x7ce   :  { %v1930_v32 = vpop.f32.mrf.mxu1 }
 0x7cf   :  { %v1886_v36 = vpop.f32.mrf.mxu0 }
 0x7d0   :  { %v3979_v40 = vadd.f32 %v1930_v32, %v1886_v36  ;;  %v2699_v53 = vpop.f32.mrf.mxu1 }
 0x7d1   :  { %v2693_v44 = vpop.f32.mrf.mxu0 }
 0x7d2   :  { %v2013_v6 = vpop.f32.mrf.mxu1 }
 0x7d3   :  { %v1972_v43 = vpop.f32.mrf.mxu0  ;;  %v2026_v18 = vsel %vm1371_vm1, %v2013_v6, -inf }
 0x7d4   :  { %v2020_v33 = vsel %vm1371_vm1, %v1972_v43, -inf  ;;  %v2710_v14 = vpop.f32.mrf.mxu1 }
 0x7d5   :  { %2021 = vmax.xlane.f32.xlu0 %v2020_v33  ;;  %v2704_v57 = vpop.f32.mrf.mxu0 }
 0x7d6   :  { %v2016_v56 = vpop.f32.mrf.mxu1 }
 0x7d7   :  { %v1975_v48 = vpop.f32.mrf.mxu0  ;;  %v2029_v11 = vsel %vm1371_vm1, %v2016_v56, -inf }
 0x7d8   :  { %v2023_v28 = vsel %vm1371_vm1, %v1975_v48, -inf  ;;  %v2711_v39 = vpop.f32.mrf.mxu1 }
 0x7d9   :  { %2024 = vmax.xlane.f32.xlu1 %v2023_v28  ;;  %v2705_v52 = vpop.f32.mrf.mxu0  ;;  %2027 = vmax.xlane.f32.xlu0 %v2026_v18  ;;  %v2883_v18 = vld [vmem:[#allocation14 + $0x70] ss:$8 sps:$4 sm:$0xff]  }
 0x7dd   :  { %1615 = vadd.xlane.f32.xlu0 %v1614_v8  ;;  %2030 = vmax.xlane.f32.xlu1 %v2029_v11 }
 0x7e1   :  { %1621 = vadd.xlane.f32.xlu0 %v1620_v16  ;;  %1618 = vadd.xlane.f32.xlu1 %v1617_v58  ;;  %v2888_v58 = vld [vmem:[#allocation14 + $0x64] ss:$8 sps:$4 sm:$0xff]  }
 0x7e5   :  { %1399 = vadd.xlane.f32.xlu0 %v1398_v47  ;;  %1624 = vadd.xlane.f32.xlu1 %v1623_v30 }
 0x7e9   :  { %1405 = vadd.xlane.f32.xlu0 %v1404_v0  ;;  %1402 = vadd.xlane.f32.xlu1 %v1401_v12  ;;  %v1836_v0 = vsel %vm1371_vm1, %v3944_v46, 0.0  ;;  %v2886_v12 = vld [vmem:[#allocation14 + $0x60] ss:$8 sps:$4 sm:$0xff]   ;;  %v1839_v46 = vsel %vm1371_vm1, %v3948_v4, 0.0  ;;  %v2900_v4 = vld [vmem:[#allocation14 + $0x24] ss:$8 sps:$4 sm:$0xff]  }
 0x7ed   :  { %1831 = vadd.xlane.f32.xlu0 %v1830_v41  ;;  %1408 = vadd.xlane.f32.xlu1 %v1407_v27 }
 0x7f1   :  { %1834 = vadd.xlane.f32.xlu1 %v1833_v38  ;;  %v2891_v38 = vld [vmem:[#allocation14 + $0x54] ss:$8 sps:$4 sm:$0xff]  }
 0x85e   :  { %v2022_v25 = vpop.xlane.xlu0 %2021 }
 0x862   :  { %v2025_v22 = vpop.xlane.xlu1 %2024  ;;  %v2028_v17 = vpop.xlane.xlu0 %2027 }
 0x863   :  { %v2032_v23 = vmax.f32 %v2022_v25, %v2028_v17 }
 0x865   :  { %v2034_v24 = vsub.f32 %v1972_v43, %v2032_v23  ;;  %v2040_v54 = vsub.f32 %v2013_v6, %v2032_v23  ;;  %v2894_v23 = vld [vmem:[#allocation14 + $0x44] ss:$8 sps:$4 sm:$0xff]  }
 0x866   :  { %v1616_v19 = vpop.xlane.xlu0 %1615  ;;  %v2031_v51 = vpop.xlane.xlu1 %2030 }
 0x867   :  { %v2036_v49 = vmul.f32 1.442695, %v2034_v24  ;;  %v2042_v59 = vmul.f32 1.442695, %v2040_v54  ;;  %v2033_v21 = vmax.f32 %v2025_v22, %v2031_v51  ;;  %v2889_v22 = vld [vmem:[#allocation14 + $0x50] ss:$8 sps:$4 sm:$0xff]  }
 0x868   :  { %v2892_v54 = vld [vmem:[#allocation14 + $0x40] ss:$8 sps:$4 sm:$0xff]   ;;  %v2897_v51 = vld [vmem:[#allocation14 + $0x34] ss:$8 sps:$4 sm:$0xff]  }
 0x869   :  { %2971 = vpow2.f32 %v2036_v49  ;;  %v2035_v42 = vsub.f32 %v1975_v48, %v2033_v21  ;;  %v2041_v37 = vsub.f32 %v2016_v56, %v2033_v21  ;;  %v2895_v21 = vld [vmem:[#allocation14 + $0x30] ss:$8 sps:$4 sm:$0xff]  }
 0x86a   :  { %v1622_v62 = vpop.xlane.xlu0 %1621  ;;  %v1619_v61 = vpop.xlane.xlu1 %1618  ;;  %2973 = vpow2.f32 %v2042_v59 }
 0x86b   :  { %v2038_v50 = vmul.f32 1.442695, %v2035_v42  ;;  %v2044_v20 = vmul.f32 1.442695, %v2041_v37  ;;  %v1626_v55 = vadd.f32 %v1622_v62, %v1616_v19  ;;  %v2898_v37 = vld [vmem:[#allocation14 + $0x20] ss:$8 sps:$4 sm:$0xff]  }
 0x86c   :  { %v2901_v62 = vld [vmem:[#allocation14 + $0x10] ss:$8 sps:$4 sm:$0xff]  }
 0x86d   :  { %2975 = vpow2.f32 %v2038_v50  ;;  %v2909_v50 = vld [vmem:[#allocation14 + $0xf4] ss:$8 sps:$4 sm:$0xff]  }
 0x86e   :  { %2977 = vpow2.f32 %v2044_v20  ;;  %v1400_v3 = vpop.xlane.xlu0 %1399  ;;  %v1625_v32 = vpop.xlane.xlu1 %1624  ;;  %v2907_v20 = vld [vmem:[#allocation14 + $0xf0] ss:$8 sps:$4 sm:$0xff]  }
 0x86f   :  { %2979 = vrcp.f32 %v1626_v55  ;;  %v1627_v36 = vadd.f32 %v1625_v32, %v1619_v61  ;;  %v2906_v61 = vld [vmem:[#allocation14 + $0x4] ss:$8 sps:$4 sm:$0xff]   ;;  %v2915_v32 = vld [vmem:[#allocation14 + $0xd4] ss:$8 sps:$4 sm:$0xff]  }
 0x870   :  { %v2912_v55 = vld [vmem:[#allocation14 + $0xe4] ss:$8 sps:$4 sm:$0xff]  }
 0x871   :  { %2981 = vrcp.f32 %v1627_v36  ;;  %v2913_v36 = vld [vmem:[#allocation14 + $0xd0] ss:$8 sps:$4 sm:$0xff]  }
 0x872   :  { %v1406_v53 = vpop.xlane.xlu0 %1405  ;;  %v1403_v44 = vpop.xlane.xlu1 %1402 }
 0x873   :  { %v1410_v6 = vadd.f32 %v1406_v53, %v1400_v3  ;;  %v2910_v3 = vld [vmem:[#allocation14 + $0xe0] ss:$8 sps:$4 sm:$0xff]   ;;  %v2918_v53 = vld [vmem:[#allocation14 + $0xc4] ss:$8 sps:$4 sm:$0xff]  }
 0x875   :  { %2983 = vrcp.f32 %v1410_v6  ;;  %v2921_v6 = vld [vmem:[#allocation14 + $0xb4] ss:$8 sps:$4 sm:$0xff]  }
 0x876   :  { %v2972_v43 = vpop.eup %2971  ;;  %v1409_v33 = vpop.xlane.xlu1 %1408 }
 0x877   :  { %v1411_v14 = vadd.f32 %v1409_v33, %v1403_v44  ;;  %v2046_v57 = vsel %vm1371_vm1, %v2972_v43, 0.0  ;;  %v2974_v56 = vpop.eup %2973  ;;  %v2916_v44 = vld [vmem:[#allocation14 + $0xc0] ss:$8 sps:$4 sm:$0xff]   ;;  %v2924_v33 = vld [vmem:[#allocation14 + $0xa4] ss:$8 sps:$4 sm:$0xff]  }
 0x878   :  { %2047 = vadd.xlane.f32.xlu0 %v2046_v57  ;;  %v2052_v39 = vsel %vm1371_vm1, %v2974_v56, 0.0  ;;  %v2927_v57 = vld [vmem:[#allocation14 + $0x94] ss:$8 sps:$4 sm:$0xff]  }
 0x879   :  { %2985 = vrcp.f32 %v1411_v14  ;;  %v2922_v14 = vld [vmem:[#allocation14 + $0xa0] ss:$8 sps:$4 sm:$0xff]  }
 0x87a   :  { %v2976_v48 = vpop.eup %2975 }
 0x87b   :  { %v2978_v28 = vpop.eup %2977  ;;  %v2049_v52 = vsel %vm1371_vm1, %v2976_v48, 0.0  ;;  %v2060_v8 = vpack.c.bf16 %v2976_v48, %v2972_v43  ;;  %v2919_v43 = vld [vmem:[#allocation14 + $0xb0] ss:$8 sps:$4 sm:$0xff]   ;;  %v2930_v48 = vld [vmem:[#allocation14 + $0x84] ss:$8 sps:$4 sm:$0xff]  }
 0x87c   :  { %v2980_v11 = vpop.eup %2979  ;;  %2053 = vadd.xlane.f32.xlu0 %v2052_v39  ;;  %2050 = vadd.xlane.f32.xlu1 %v2049_v52  ;;  %v2061_v16 = vpack.c.bf16 %v2978_v28, %v2974_v56  ;;  %v2055_v27 = vsel %vm1371_vm1, %v2978_v28, 0.0  ;;  %v2925_v56 = vld [vmem:[#allocation14 + $0x90] ss:$8 sps:$4 sm:$0xff]   ;;  %v2928_v28 = vld [vmem:[#allocation14 + $0x80] ss:$8 sps:$4 sm:$0xff]   ;;  %v1835_v39 = vpop.xlane.xlu1 %1834 }
 0x87d   :  { %2721 = vmatmul.mubr.msk.bf16.vlgmr.msra.gmra.mxu1 %vm1371_vm1, %v2060_v8  ;;  %v1720_v47 = vmul.f32 %v2980_v11, %v3936_v63 }
 0x87e   :  { %v2982_v30 = vpop.eup %2981  ;;  %2715 = vmatmul.mubr.msk.bf16.vlgmr.msra.gmra.mxu0 %vm1371_vm1, %v2061_v16 }
 0x87f   :  { %2371 = vmatpush1.bf16.msra.mxu0 %v2883_v18  ;;  %v1721_v41 = vmul.f32 %v2982_v30, %v3938_v9  ;;  %v2155_v35 = vadd.f32 %v1720_v47, %v3573_v1  ;;  %v1832_v18 = vpop.xlane.xlu0 %1831 }
 0x880   :  { %1837 = vadd.xlane.f32.xlu0 %v1836_v0  ;;  %2372 = vmatprep.subr.bf16.mxu0 %v2888_v58 }
 0x881   :  { %2056 = vadd.xlane.f32.xlu1 %v2055_v27  ;;  %v2157_v63 = vadd.f32 %v1721_v41, %v3583_v45 }
 0x882   :  { %v2984_v25 = vpop.eup %2983 }
 0x883   :  { %2373 = vmatpush1.bf16.msra.mxu0 %v2886_v12  ;;  %v2163_v17 = vpack.c.bf16 %v2157_v63, %v2155_v35  ;;  %v1504_v9 = vmul.f32 %v2984_v25, %v3887_v5  ;;  %v2903_v5 = vld [vmem:[#allocation14 + $0x14] ss:$8 sps:$4 sm:$0xff]  }
 0x884   :  { %2374 = vmatprep.subr.bf16.mxu0 %v2891_v38 }
 0x885   :  { %1840 = vadd.xlane.f32.xlu1 %v1839_v46  ;;  %2402 = vmatprep.mubr.bf16.mxu0 %v2163_v17  ;;  %v2154_v49 = vadd.f32 %v1504_v9, %v3575_v10 }
 0x886   :  { %v2986_v24 = vpop.eup %2985 }
 0x887   :  { %2375 = vmatpush1.bf16.msra.mxu0 %v2889_v22  ;;  %v1505_v19 = vmul.f32 %v2986_v24, %v3889_v31  ;;  %v2904_v31 = vld [vmem:[#allocation14] ss:$8 sps:$4 sm:$0xff]  }
 0x888   :  { %2376 = vmatprep.subr.bf16.mxu0 %v2894_v23 }
 0x889   :  { %v2156_v59 = vadd.f32 %v1505_v19, %v3585_v15 }
 0x88b   :  { %2377 = vmatpush1.bf16.msra.mxu0 %v2892_v54  ;;  %v2162_v42 = vpack.c.bf16 %v2156_v59, %v2154_v49 }
 0x88c   :  { %2378 = vmatprep.subr.bf16.mxu0 %v2897_v51 }
 0x88f   :  { %2379 = vmatpush1.bf16.msra.mxu0 %v2895_v21 }
 0x890   :  { %2380 = vmatprep.subr.bf16.mxu0 %v2900_v4 }
 0x893   :  { %2381 = vmatpush1.bf16.msra.mxu0 %v2898_v37 }
 0x894   :  { %2382 = vmatprep.subr.bf16.mxu0 %v2903_v5 }
 0x897   :  { %2383 = vmatpush1.bf16.msra.mxu0 %v2901_v62 }
 0x898   :  { %2384 = vmatprep.subr.bf16.mxu0 %v2906_v61  ;;  %v2198_v61 = vld [vmem:[%s4059_s12] sm:$0x3]  ;;  %s3201_s12 = smov [#allocation16]  }
 0x899   :  { %s2444_s18 = sshll.u32 %s3201_s12, 4  ;;  %s2445_s18 = int_to_ptr.vmem [resolvable:$true] %s2444_s18 }
 0x89a   :  { %s3155_s9 = scalar_lea.vmem %s2445_s18, 1024  ;;  %p3160_p13 = scmp.lt.s32.totalorder %s2445_s18, %s2445_s18 }
 0x89b   :  { %2385 = vmatpush1.bf16.msra.mxu0 %v2904_v31  ;;  %v2203_v31 = vrot.slane %v2198_v61, %v3530_v29  ;;  %p3156_p12 = scmp.ne.s32.totalorder %s2445_s18, %s3155_s9  ;;  %p3161_p0 = scmp.lt.s32.totalorder %s3155_s9, %s3155_s9 }
 0x89c   :  { %2386 = vmatprep.subr.bf16.mxu0 %v2909_v50  ;;  %v2207_v50 = vrot.slane %v2198_v61, %v3528_v26 }
 0x89d   :  { %p3162_p1 = por %p3161_p0, %p3160_p13 }
 0x89f   :  { %2387 = vmatpush2.bf16.msra.mxu0 %v2907_v20  ;;  %p3163_p2 = pnand %p3162_p1, %p3156_p12 }
 0x8a0   :  { %2388 = vmatprep.subr.bf16.mxu0 %v2912_v55 }
 0x8a3   :  { %2389 = vmatpush2.bf16.msra.mxu0 %v2910_v3 }
 0x8a4   :  { %2390 = vmatprep.subr.bf16.mxu0 %v2915_v32 }
 0x8a7   :  { %2391 = vmatpush2.bf16.msra.mxu0 %v2913_v36 }
 0x8a8   :  { %2392 = vmatprep.subr.bf16.mxu0 %v2918_v53 }
 0x8ab   :  { %2393 = vmatpush2.bf16.msra.mxu0 %v2916_v44 }
 0x8ac   :  { %2394 = vmatprep.subr.bf16.mxu0 %v2921_v6 }
 0x8af   :  { %2395 = vmatpush2.bf16.msra.mxu0 %v2919_v43 }
 0x8b0   :  { %2396 = vmatprep.subr.bf16.mxu0 %v2924_v33 }
 0x8b3   :  { %2397 = vmatpush2.bf16.msra.mxu0 %v2922_v14 }
 0x8b4   :  { %2398 = vmatprep.subr.bf16.mxu0 %v2927_v57 }
 0x8b7   :  { %2399 = vmatpush2.bf16.msra.mxu0 %v2925_v56 }
 0x8b8   :  { %2400 = vmatprep.subr.bf16.mxu0 %v2930_v48 }
 0x8bb   :  { %2401 = vmatpush2.bf16.msra.mxu0 %v2928_v28 }
 0x8be   :  { %2403 = vmatmul.mubr.bf16.vlgmr.msra.gmra.mxu0 %v2162_v42 }
 0x901   :  { %v2048_v52 = vpop.xlane.xlu0 %2047 }
 0x905   :  { %v2054_v8 = vpop.xlane.xlu0 %2053  ;;  %v2051_v11 = vpop.xlane.xlu1 %2050 }
 0x906   :  { %v2058_v22 = vadd.f32 %v2054_v8, %v2048_v52 }
 0x909   :  { %v1838_v16 = vpop.xlane.xlu0 %1837 }
 0x90a   :  { %v1842_v58 = vadd.f32 %v1838_v16, %v1832_v18  ;;  %v2057_v47 = vpop.xlane.xlu1 %2056 }
 0x90b   :  { %v2059_v17 = vadd.f32 %v2057_v47, %v2051_v11 }
 0x90c   :  { %2987 = vrcp.f32 %v1842_v58 }
 0x90e   :  { %v1841_v30 = vpop.xlane.xlu1 %1840 }
 0x90f   :  { %v1843_v0 = vadd.f32 %v1841_v30, %v1835_v39 }
 0x911   :  { %2989 = vrcp.f32 %v1843_v0 }
 0x912   :  { %2991 = vrcp.f32 %v2058_v22 }
 0x913   :  { %2993 = vrcp.f32 %v2059_v17 }
 0x919   :  { %v2988_v12 = vpop.eup %2987 }
 0x91a   :  { %v1936_v41 = vmul.f32 %v2988_v12, %v3977_v2 }
 0x91c   :  { %v2158_v35 = vadd.f32 %v1936_v41, %v3631_v7 }
 0x91e   :  { %v2990_v27 = vpop.eup %2989 }
 0x91f   :  { %v1937_v38 = vmul.f32 %v2990_v27, %v3979_v40  ;;  %v2992_v51 = vpop.eup %2991 }
 0x920   :  { %v2994_v21 = vpop.eup %2993 }
 0x921   :  { %v2160_v63 = vadd.f32 %v1937_v38, %v3624_v60 }
 0x923   :  { %v2164_v25 = vpack.c.bf16 %v2160_v63, %v2158_v35 }
 0x93d   :  { %v2143_v46 = vpop.f32.mrf.mxu1 }
 0x93e   :  { %v2099_v23 = vpop.f32.mrf.mxu0 }
 0x93f   :  { %v2144_v9 = vadd.f32 %v2143_v46, %v2099_v23  ;;  %v2722_v24 = vpop.f32.mrf.mxu1 }
 0x940   :  { %v2716_v54 = vpop.f32.mrf.mxu0 }
 0x941   :  { %v2146_v19 = vpop.f32.mrf.mxu1  ;;  %v2152_v49 = vmul.f32 %v2992_v51, %v2144_v9 }
 0x942   :  { %v2102_v2 = vpop.f32.mrf.mxu0 }
 0x943   :  { %v2147_v59 = vadd.f32 %v2146_v19, %v2102_v2  ;;  %v2723_v40 = vpop.f32.mrf.mxu1  ;;  %v2159_v37 = vadd.f32 %v2152_v49, %v3603_v34 }
 0x944   :  { %v2717_v42 = vpop.f32.mrf.mxu0 }
 0x945   :  { %v2153_v4 = vmul.f32 %v2994_v21, %v2147_v59 }
 0x947   :  { %v2161_v5 = vadd.f32 %v2153_v4, %v3610_v13 }
 0x949   :  { %v2165_v62 = vpack.c.bf16 %v2161_v5, %v2159_v37 }
 0x94b   :  { %2412 = vmatprep.mubr.bf16.mxu0 %v2165_v62 }
 0x94c   :  { %2413 = vmatmul.mubr.bf16.gmra.mxu0 %v2164_v25 }
 0x97e   :  { %v2404_v20 = vpop.f32.mrf.mxu0 }
 0x97f   :  { %v2405_v55 = vadd.f32 %v2404_v20, %v2203_v31 }
 0x980   :  { %v2406_v3 = vpop.f32.mrf.mxu0 }
 0x981   :  { %v2423_v32 = vadd.f32 %v2405_v55, %v3575_v10  ;;  %v2407_v36 = vadd.f32 %v2406_v3, %v2207_v50 }
 0x982   :  { %v2408_v53 = vpop.f32.mrf.mxu0 }
 0x983   :  { %2431 = vst [vmem:[#allocation16] sm:$0xff] %v2423_v32  ;;  %v2424_v44 = vadd.f32 %v2407_v36, %v3573_v1  ;;  %v2409_v6 = vadd.f32 %v2408_v53, %v2203_v31 }
 0x984   :  { %v2410_v43 = vpop.f32.mrf.mxu0 }
 0x985   :  { %2432 = vst [vmem:[#allocation16 + $0x8] sm:$0xff] %v2424_v44  ;;  %v2425_v33 = vadd.f32 %v2409_v6, %v3585_v15  ;;  %v2411_v14 = vadd.f32 %v2410_v43, %v2207_v50 }
 0x987   :  { %2433 = vst [vmem:[#allocation16 + $0x10] sm:$0xff] %v2425_v33  ;;  %v2426_v29 = vadd.f32 %v2411_v14, %v3583_v45 }
 0x989   :  { %2434 = vst [vmem:[#allocation16 + $0x18] sm:$0xff] %v2426_v29 }
 0xa0c   :  { %v2414_v26 = vpop.f32.mrf.mxu0 }
 0xa0d   :  { %v2415_v57 = vadd.f32 %v2414_v26, %v2203_v31 }
 0xa0e   :  { %v2416_v56 = vpop.f32.mrf.mxu0 }
 0xa0f   :  { %v2427_v10 = vadd.f32 %v2415_v57, %v3631_v7  ;;  %v2417_v48 = vadd.f32 %v2416_v56, %v2207_v50 }
 0xa10   :  { %v2418_v28 = vpop.f32.mrf.mxu0 }
 0xa11   :  { %2435 = vst [vmem:[#allocation16 + $0x20] sm:$0xff] %v2427_v10  ;;  %v2428_v1 = vadd.f32 %v2417_v48, %v3603_v34  ;;  %v2419_v18 = vadd.f32 %v2418_v28, %v2203_v31 }
 0xa12   :  { %v2420_v39 = vpop.f32.mrf.mxu0 }
 0xa13   :  { %2436 = vst [vmem:[#allocation16 + $0x28] sm:$0xff] %v2428_v1  ;;  %v2429_v15 = vadd.f32 %v2419_v18, %v3624_v60  ;;  %v2421_v52 = vadd.f32 %v2420_v39, %v2207_v50 }
 0xa15   :  { %2437 = vst [vmem:[#allocation16 + $0x30] sm:$0xff] %v2429_v15  ;;  %v2430_v45 = vadd.f32 %v2421_v52, %v3610_v13 }
 0xa17   :  { %2438 = vst [vmem:[#allocation16 + $0x38] sm:$0xff] %v2430_v45 }
 0xa18   :  { %3166 = shalt.err (!%p3163_p2)
}
 0xa19   :  { %2450 = dma.vmem_to_hbm [thread:$0]  %s2445_s18, 1024, %s4060_s13, [#allocation4], %s3189_s30, %s3189_s30, %s3190_s14  }
 0xa1a   :  { %3185 = dma.done.wait [#allocation4], 1024  }
 0xa1b   :  { %3186 = vsyncadd [#allocation4], 4294966272 }
 0xa1c   :  { %2454 = vsyncpa [#allocation3], 1 }
 0xa1d   :  { %2455 = vsyncpa [#allocation6], 1 }
 0xa1e   :  { %2456 = vsyncpa [#allocation9], 1 }
 0xa1f   :  { %2457 = vsyncpa [#allocation12], 1 }
 0xa20   :  { %2458 = vsyncpa [#allocation15], 1 }
 0xa21   :  { %2459 = vsyncpa [#allocation4], 1 }

</bundles_post_ra>
